<compile_context>
chip_gen: v7x
topology: tpu7x:2x2x1
jax: 0.10.0
libtpu: 0.0.40
codegen_flags: <defaults>
</compile_context>

<pallas_src>
import numpy as np
import jax
import jax.numpy as jnp
from jax import lax
from jax.experimental import pallas as pl
from jax.experimental.pallas import tpu as pltpu

# ---- static configuration (mirrors `args`) ----
BATCH     = 2
NTASKS    = 4      # args.ntasks
CAP       = 8      # args.semantic_cap_size
SEQ       = 8      # args.max_seq_length
HIDDEN    = 768    # hard-wired in the PyTorch module
TASK      = 2      # args.task (static python int -> tsv row / mask baked into kernel)
IN_CH     = SEQ * CAP            # tsv capsule in_channel
NUM_ITERS = 3
NT_ACTIVE = TASK + 1             # tsv[TASK][n] == 1  <=>  n <= TASK
BS        = BATCH * SEQ
EPS       = 1e-30                # guards 1/sqrt(0); numerically invisible otherwise

# torch's `vote_outputs.view(B, S, -1)` raw-reinterprets a buffer contiguous in
# (capsule, batch, class) order; the single lane->row shuffle used below is that view
# exactly, but only when SEQ == CAP (true here).
assert SEQ == CAP, "raw-view shortcut in the kernel requires SEQ == CAP"
assert 1 <= NT_ACTIVE <= NTASKS


# ---------------------------------- the fused kernel -----------------------------------

def capsnet_kernel(x_ref, fcw_ref, fcb_ref, segn_ref, rw_ref, segc_ref,
                   lw_ref, lb_ref, out_ref):
    """semantic capsules (+squash over tasks) -> fused priors -> dynamic routing -> larger.

    x_ref   : (BS, HIDDEN) f32
    fcw_ref : (HIDDEN, NTASKS*CAP) f32   column n*CAP+ce = fc1[n].weight[ce, :]
    fcb_ref : (1, NTASKS*CAP) f32        packed fc1 biases
    segn_ref: (NTASKS*CAP, NT_ACTIVE*CAP) f32  0/1 task-norm segment-sum+broadcast matrix
    rw_ref  : (SEQ*NT_ACTIVE*CAP, NT_ACTIVE*CAP*SEQ) f32  block-diag fused route weights
    segc_ref: (CAP*SEQ, CAP*SEQ) f32     0/1 per-capsule segment-sum+broadcast matrix
    lw_ref  : (CAP, HIDDEN) bf16         larger.weight.T
    lb_ref  : (1, HIDDEN) f32            larger.bias
    out_ref : (BS, HIDDEN) f32
    """
    f32 = jnp.float32

    # ---- stage 1: all NTASKS Linear(768 -> CAP) in one MXU dot, bias as a VPU add,
    #      squash-over-tasks norm via one segment matmul (MXU), rsqrt on the EUP.
    a = jnp.dot(x_ref[...], fcw_ref[...], preferred_element_type=f32) + fcb_ref[...]
    sq_b = jnp.dot(a * a, segn_ref[...], preferred_element_type=f32)     # (BS, NTA*CAP)
    scale = sq_b / (1.0 + sq_b) * lax.rsqrt(sq_b + EPS)
    sem = a[:, :NT_ACTIVE * CAP] * scale                                 # (BS, NTA*CAP)

    # ---- stage 2: ONE rows->lanes shuffle on the combined squashed tensor
    #      (lane order (s, n, ce)), then ONE fused block-diagonal prior matmul.
    rows = []
    for b in range(BATCH):
        rows.append(jnp.concatenate(
            [sem[b * SEQ + s: b * SEQ + s + 1, :] for s in range(SEQ)], axis=1))
    sem_l = jnp.concatenate(rows, axis=0)                                # (B, SEQ*NTA*CAP)
    priors_all = jnp.dot(sem_l, rw_ref[...], preferred_element_type=f32)  # (B, NTA*CAP*SEQ)
    # per-task priors, lane = c*SEQ + s'  (lane-dense routing state)
    pri = [priors_all[:, n * CAP * SEQ:(n + 1) * CAP * SEQ] for n in range(NT_ACTIVE)]

    seg = segc_ref[...]                                                  # (CAP*SEQ, CAP*SEQ)

    def squash_caps(v):  # per-capsule squash; norm = segment-sum+broadcast on the MXU
        sqn = jnp.dot(v * v, seg, preferred_element_type=f32)
        return sqn / (1.0 + sqn) * lax.rsqrt(sqn + EPS) * v

    def delta(p, outputs):  # per-capsule <prior, output>, broadcast over the s' lanes
        return jnp.dot(p * outputs, seg, preferred_element_type=f32)

    # ---- stage 3: 3-iteration dynamic routing, statically pruned to the active tasks
    # (masked tasks carry logits == -10000 whose exp underflows to exactly 0 in f32, so
    # dropping them is bit-exact w.r.t. the reference).
    # Iteration 0: all active logits are exactly 0 -> routing weights are uniform.
    vote = pri[0]
    for n in range(1, NT_ACTIVE):
        vote = vote + pri[n]
    vote = vote * (1.0 / NT_ACTIVE)                                      # (B, CAP*SEQ)
    outputs = squash_caps(vote)
    logits = [delta(pri[n], outputs) for n in range(NT_ACTIVE)]

    for it in range(1, NUM_ITERS):
        m = logits[0]
        for n in range(1, NT_ACTIVE):
            m = jnp.maximum(m, logits[n])
        es = [jnp.exp(logits[n] - m) for n in range(NT_ACTIVE)]          # EUP
        denom = es[0]
        for n in range(1, NT_ACTIVE):
            denom = denom + es[n]
        inv = pl.reciprocal(denom, approx=True)                          # EUP slot
        vote = es[0] * pri[0]
        for n in range(1, NT_ACTIVE):
            vote = vote + es[n] * pri[n]
        vote = vote * inv
        if it != NUM_ITERS - 1:          # last iteration's squash/delta is dead code
            outputs = squash_caps(vote)
            for n in range(NT_ACTIVE):
                logits[n] = logits[n] + delta(pri[n], outputs)

    # ---- stage 4: single lanes->rows shuffle == torch's raw .view (valid: SEQ == CAP),
    #      then `larger` Linear (bf16 MXU operands) + broadcast bias add, lane-dense
    #      (BS, 768) f32 store.
    h = jnp.concatenate([vote[:, c * SEQ:(c + 1) * SEQ] for c in range(CAP)], axis=0)
    out_ref[...] = (jnp.dot(h.astype(jnp.bfloat16), lw_ref[...],
                            preferred_element_type=f32) + lb_ref[...])


# ------------------------- host-side parameter packing (ONE-TIME) -----------------------

def pack_params(params):
    """Parameter-only packing; call once per parameter set and reuse the result."""
    fc_w     = np.asarray(params["fc_w"], np.float32)       # (NTASKS, CAP, HIDDEN)
    fc_b     = np.asarray(params["fc_b"], np.float32)       # (NTASKS, CAP)
    route_w  = np.asarray(params["route_w"], np.float32)    # (CAP, NTASKS, IN_CH, SEQ)
    larger_w = np.asarray(params["larger_w"], np.float32)   # (HIDDEN, CAP)
    larger_b = np.asarray(params["larger_b"], np.float32)   # (HIDDEN,)

    # all NTASKS fc1 Linears fused: column n*CAP+ce = fc1[n].weight[ce, :]
    fcw = np.transpose(fc_w, (2, 0, 1)).reshape(HIDDEN, NTASKS * CAP)
    fcb = fc_b.reshape(1, NTASKS * CAP)

    # task-norm segment-sum+broadcast: (a*a) @ segn -> at active lane (n, ce),
    # sum over ALL tasks n' of a[:, n'*CAP + ce]^2
    segn = np.tile(np.eye(CAP, dtype=np.float32), (NTASKS, NT_ACTIVE))

    # fused block-diagonal route weights:
    #   row = s*NT_ACTIVE*CAP + n_in*CAP + ce, col = n_out*CAP*SEQ + c*SEQ + s'
    #   value = route_w[c, n, s*CAP+ce, s'] iff n_in == n_out == n, else 0
    rw_a = route_w[:, :NT_ACTIVE]                                        # (CAP, NTA, IN, SEQ)
    t = np.transpose(rw_a.reshape(CAP, NT_ACTIVE, SEQ, CAP, SEQ),
                     (1, 2, 3, 0, 4))                                    # (n, s, ce, c, s')
    rw_f = np.zeros((SEQ, NT_ACTIVE, CAP, NT_ACTIVE, CAP, SEQ), np.float32)
    for n in range(NT_ACTIVE):
        rw_f[:, n, :, n, :, :] = t[n]
    rw_f = rw_f.reshape(SEQ * NT_ACTIVE * CAP, NT_ACTIVE * CAP * SEQ)    # (192, 192)

    # per-capsule segment-sum+broadcast matrix for routing (sqn / delta)
    segc = np.kron(np.eye(CAP, dtype=np.float32), np.ones((SEQ, SEQ), np.float32))

    # larger Linear: weight.T in bf16 (MXU operand), bias as a separate f32 row
    lw = larger_w.T                                                      # (CAP, HIDDEN)
    lb = larger_b.reshape(1, HIDDEN)

    return dict(
        fcw=jnp.asarray(fcw, jnp.float32),
        fcb=jnp.asarray(fcb, jnp.float32),
        segn=jnp.asarray(segn, jnp.float32),
        rw=jnp.asarray(rw_f, jnp.float32),
        segc=jnp.asarray(segc, jnp.float32),
        lw=jnp.asarray(lw, jnp.bfloat16),
        lb=jnp.asarray(lb, jnp.float32),
    )


# ---------------------------------- wrapper (glue) --------------------------------------

def capsnet_forward(x, packed):
    B, S, H = x.shape
    x2d = x.reshape(B * S, H)        # no ones column: K stays 768 (MXU-tile aligned)
    out2d = pl.pallas_call(
        capsnet_kernel,
        out_shape=jax.ShapeDtypeStruct((B * S, HIDDEN), jnp.float32),
        in_specs=[pl.BlockSpec(memory_space=pltpu.MemorySpace.VMEM)] * 8,
        out_specs=pl.BlockSpec(memory_space=pltpu.MemorySpace.VMEM),
    )(x2d, packed["fcw"], packed["fcb"], packed["segn"], packed["rw"],
      packed["segc"], packed["lw"], packed["lb"])
    # NOTE: BS = 16 badly underfills the MXU M dim; if the call site ever has several
    # sequences / micro-batches, stack them and add a leading grid axis marked
    # dimension_semantics=("parallel",) so v7x's 2 TensorCores both get work.  At this
    # size a grid would only add per-invocation overhead, so the kernel stays gridless.
    return out2d.reshape(B, S, HIDDEN)


# ------------------------------- pure-JAX reference -------------------------------------

def reference_forward(x, params):
    B, S, H = x.shape
    # semantic layer
    outs = []
    for n in range(NTASKS):
        y = x @ params["fc_w"][n].T + params["fc_b"][n]          # (B, S, CAP)
        outs.append(y.reshape(B, -1, 1))
    outputs = jnp.concatenate(outs, axis=-1)                     # (B, S*CAP, NT)
    sq = jnp.sum(outputs ** 2, axis=-1, keepdims=True)
    outputs = sq / (1.0 + sq) * outputs / jnp.sqrt(sq)
    sem = jnp.transpose(outputs, (0, 2, 1))                      # (B, NT, S*CAP)

    # tsv capsule layer
    rw = params["route_w"]                                       # (CAP, NT, IN, S)
    priors = jnp.matmul(sem[None, :, :, None, :], rw[:, None, :, :, :])  # (CAP,B,NT,1,S)
    tsv_row = (jnp.arange(NTASKS) <= TASK).astype(jnp.float32)
    mask = jnp.where(tsv_row == 0, -10000.0, 0.0)
    logits = jnp.zeros_like(priors)
    vote = None
    for i in range(NUM_ITERS):
        logits = logits * tsv_row.reshape(1, 1, -1, 1, 1) + mask.reshape(1, 1, -1, 1, 1)
        probs = jax.nn.softmax(logits, axis=2)
        vote = jnp.sum(probs * priors, axis=2, keepdims=True)    # (CAP,B,1,1,S)
        sqn = jnp.sum(vote ** 2, axis=-1, keepdims=True)
        outputs_v = sqn / (1.0 + sqn) * vote / jnp.sqrt(sqn)
        if i != NUM_ITERS - 1:
            delta = jnp.sum(priors * outputs_v, axis=-1, keepdims=True)
            logits = logits + delta
    h = vote.reshape(B, S, -1)                                   # raw view, like torch
    h = h @ params["larger_w"].T + params["larger_b"]
    return h


# ------------------------------------- params -------------------------------------------

def init_params(key):
    ks = jax.random.split(key, 5)
    return dict(
        fc_w=0.05 * jax.random.normal(ks[0], (NTASKS, CAP, HIDDEN), jnp.float32),
        fc_b=0.01 * jax.random.normal(ks[1], (NTASKS, CAP), jnp.float32),
        route_w=jax.random.normal(ks[2], (CAP, NTASKS, IN_CH, SEQ), jnp.float32),
        larger_w=0.05 * jax.random.normal(ks[3], (HIDDEN, CAP), jnp.float32),
        larger_b=0.01 * jax.random.normal(ks[4], (HIDDEN,), jnp.float32),
    )


if __name__ == "__main__":
    key = jax.random.PRNGKey(0)
    kx, kp = jax.random.split(key)
    params = init_params(kp)
    x = jax.random.normal(kx, (BATCH, SEQ, HIDDEN), jnp.float32)

    packed = pack_params(params)                 # one-time, parameter-only packing
    fwd = jax.jit(capsnet_forward)
    out = jax.block_until_ready(fwd(x, packed))
    assert out.shape == (BATCH, SEQ, HIDDEN)

    ref = reference_forward(x, params)
    np.testing.assert_allclose(np.asarray(out), np.asarray(ref), rtol=3e-2, atol=3e-2)
    print("KERNEL_OK")
</pallas_src>

<mosaic_0001>
module attributes {stable_mosaic.version = 11 : i64} {
  func.func @capsnet_kernel(%arg0: memref<16x768xf32, #tpu.memory_space<vmem>>, %arg1: memref<768x32xf32, #tpu.memory_space<vmem>>, %arg2: memref<1x32xf32, #tpu.memory_space<vmem>>, %arg3: memref<32x24xf32, #tpu.memory_space<vmem>>, %arg4: memref<192x192xf32, #tpu.memory_space<vmem>>, %arg5: memref<64x64xf32, #tpu.memory_space<vmem>>, %arg6: memref<8x768xbf16, #tpu.memory_space<vmem>>, %arg7: memref<1x768xf32, #tpu.memory_space<vmem>>, %arg8: memref<16x768xf32, #tpu.memory_space<vmem>>) attributes {dimension_semantics = [], scalar_prefetch = 0 : i64, scratch_operands = 0 : i64, tpu.core_type = #tpu.core_type<tc>} {
    %c0 = arith.constant 0 : index
    %c0_0 = arith.constant 0 : index
    %0 = vector.load %arg0[%c0, %c0_0] : memref<16x768xf32, #tpu.memory_space<vmem>>, vector<16x768xf32>
    %c0_1 = arith.constant 0 : index
    %c0_2 = arith.constant 0 : index
    %1 = vector.load %arg1[%c0_1, %c0_2] : memref<768x32xf32, #tpu.memory_space<vmem>>, vector<768x32xf32>
    %cst = arith.constant dense<0.000000e+00> : vector<16x32xf32>
    %2 = tpu.matmul %0, %1, %cst {dimension_numbers = #tpu.dot_dimension_numbers<[1], [0], [0], [1], [0, 0, 1, 1], [], []>} : vector<16x768xf32>, vector<768x32xf32>, vector<16x32xf32> -> vector<16x32xf32>
    %c0_3 = arith.constant 0 : index
    %c0_4 = arith.constant 0 : index
    %3 = vector.load %arg2[%c0_3, %c0_4] : memref<1x32xf32, #tpu.memory_space<vmem>>, vector<1x32xf32>
    %4 = vector.broadcast %3 : vector<1x32xf32> to vector<16x32xf32>
    %5 = arith.addf %2, %4 : vector<16x32xf32>
    %6 = arith.mulf %5, %5 : vector<16x32xf32>
    %c0_5 = arith.constant 0 : index
    %c0_6 = arith.constant 0 : index
    %7 = vector.load %arg3[%c0_5, %c0_6] : memref<32x24xf32, #tpu.memory_space<vmem>>, vector<32x24xf32>
    %cst_7 = arith.constant dense<0.000000e+00> : vector<16x24xf32>
    %8 = tpu.matmul %6, %7, %cst_7 {dimension_numbers = #tpu.dot_dimension_numbers<[1], [0], [0], [1], [0, 0, 1, 1], [], []>} : vector<16x32xf32>, vector<32x24xf32>, vector<16x24xf32> -> vector<16x24xf32>
    %cst_8 = arith.constant 1.000000e+00 : f32
    %9 = vector.broadcast %cst_8 : f32 to vector<16x24xf32>
    %10 = arith.addf %9, %8 : vector<16x24xf32>
    %11 = arith.divf %8, %10 : vector<16x24xf32>
    %cst_9 = arith.constant 1.000000e-30 : f32
    %12 = vector.broadcast %cst_9 : f32 to vector<16x24xf32>
    %13 = arith.addf %8, %12 : vector<16x24xf32>
    %14 = math.rsqrt %13 : vector<16x24xf32>
    %15 = arith.mulf %11, %14 : vector<16x24xf32>
    %16 = vector.extract_strided_slice %5 {offsets = [0, 0], sizes = [16, 24], strides = [1, 1]} : vector<16x32xf32> to vector<16x24xf32>
    %17 = arith.mulf %16, %15 : vector<16x24xf32>
    %18 = vector.extract_strided_slice %17 {offsets = [0, 0], sizes = [1, 24], strides = [1, 1]} : vector<16x24xf32> to vector<1x24xf32>
    %19 = vector.extract_strided_slice %17 {offsets = [1, 0], sizes = [1, 24], strides = [1, 1]} : vector<16x24xf32> to vector<1x24xf32>
    %20 = vector.extract_strided_slice %17 {offsets = [2, 0], sizes = [1, 24], strides = [1, 1]} : vector<16x24xf32> to vector<1x24xf32>
    %21 = vector.extract_strided_slice %17 {offsets = [3, 0], sizes = [1, 24], strides = [1, 1]} : vector<16x24xf32> to vector<1x24xf32>
    %22 = vector.extract_strided_slice %17 {offsets = [4, 0], sizes = [1, 24], strides = [1, 1]} : vector<16x24xf32> to vector<1x24xf32>
    %23 = vector.extract_strided_slice %17 {offsets = [5, 0], sizes = [1, 24], strides = [1, 1]} : vector<16x24xf32> to vector<1x24xf32>
    %24 = vector.extract_strided_slice %17 {offsets = [6, 0], sizes = [1, 24], strides = [1, 1]} : vector<16x24xf32> to vector<1x24xf32>
    %25 = vector.extract_strided_slice %17 {offsets = [7, 0], sizes = [1, 24], strides = [1, 1]} : vector<16x24xf32> to vector<1x24xf32>
    %26 = tpu.concatenate %18, %19, %20, %21, %22, %23, %24, %25 in 1 : vector<1x24xf32>, vector<1x24xf32>, vector<1x24xf32>, vector<1x24xf32>, vector<1x24xf32>, vector<1x24xf32>, vector<1x24xf32>, vector<1x24xf32> -> vector<1x192xf32>
    %27 = vector.extract_strided_slice %17 {offsets = [8, 0], sizes = [1, 24], strides = [1, 1]} : vector<16x24xf32> to vector<1x24xf32>
    %28 = vector.extract_strided_slice %17 {offsets = [9, 0], sizes = [1, 24], strides = [1, 1]} : vector<16x24xf32> to vector<1x24xf32>
    %29 = vector.extract_strided_slice %17 {offsets = [10, 0], sizes = [1, 24], strides = [1, 1]} : vector<16x24xf32> to vector<1x24xf32>
    %30 = vector.extract_strided_slice %17 {offsets = [11, 0], sizes = [1, 24], strides = [1, 1]} : vector<16x24xf32> to vector<1x24xf32>
    %31 = vector.extract_strided_slice %17 {offsets = [12, 0], sizes = [1, 24], strides = [1, 1]} : vector<16x24xf32> to vector<1x24xf32>
    %32 = vector.extract_strided_slice %17 {offsets = [13, 0], sizes = [1, 24], strides = [1, 1]} : vector<16x24xf32> to vector<1x24xf32>
    %33 = vector.extract_strided_slice %17 {offsets = [14, 0], sizes = [1, 24], strides = [1, 1]} : vector<16x24xf32> to vector<1x24xf32>
    %34 = vector.extract_strided_slice %17 {offsets = [15, 0], sizes = [1, 24], strides = [1, 1]} : vector<16x24xf32> to vector<1x24xf32>
    %35 = tpu.concatenate %27, %28, %29, %30, %31, %32, %33, %34 in 1 : vector<1x24xf32>, vector<1x24xf32>, vector<1x24xf32>, vector<1x24xf32>, vector<1x24xf32>, vector<1x24xf32>, vector<1x24xf32>, vector<1x24xf32> -> vector<1x192xf32>
    %36 = tpu.concatenate %26, %35 in 0 : vector<1x192xf32>, vector<1x192xf32> -> vector<2x192xf32>
    %c0_10 = arith.constant 0 : index
    %c0_11 = arith.constant 0 : index
    %37 = vector.load %arg4[%c0_10, %c0_11] : memref<192x192xf32, #tpu.memory_space<vmem>>, vector<192x192xf32>
    %cst_12 = arith.constant dense<0.000000e+00> : vector<2x192xf32>
    %38 = tpu.matmul %36, %37, %cst_12 {dimension_numbers = #tpu.dot_dimension_numbers<[1], [0], [0], [1], [0, 0, 1, 1], [], []>} : vector<2x192xf32>, vector<192x192xf32>, vector<2x192xf32> -> vector<2x192xf32>
    %39 = vector.extract_strided_slice %38 {offsets = [0, 0], sizes = [2, 64], strides = [1, 1]} : vector<2x192xf32> to vector<2x64xf32>
    %40 = vector.extract_strided_slice %38 {offsets = [0, 64], sizes = [2, 64], strides = [1, 1]} : vector<2x192xf32> to vector<2x64xf32>
    %41 = vector.extract_strided_slice %38 {offsets = [0, 128], sizes = [2, 64], strides = [1, 1]} : vector<2x192xf32> to vector<2x64xf32>
    %c0_13 = arith.constant 0 : index
    %c0_14 = arith.constant 0 : index
    %42 = vector.load %arg5[%c0_13, %c0_14] : memref<64x64xf32, #tpu.memory_space<vmem>>, vector<64x64xf32>
    %43 = arith.addf %39, %40 : vector<2x64xf32>
    %44 = arith.addf %43, %41 : vector<2x64xf32>
    %cst_15 = arith.constant 0.333333343 : f32
    %45 = vector.broadcast %cst_15 : f32 to vector<2x64xf32>
    %46 = arith.mulf %44, %45 : vector<2x64xf32>
    %47 = arith.mulf %46, %46 : vector<2x64xf32>
    %cst_16 = arith.constant dense<0.000000e+00> : vector<2x64xf32>
    %48 = tpu.matmul %47, %42, %cst_16 {dimension_numbers = #tpu.dot_dimension_numbers<[1], [0], [0], [1], [0, 0, 1, 1], [], []>} : vector<2x64xf32>, vector<64x64xf32>, vector<2x64xf32> -> vector<2x64xf32>
    %cst_17 = arith.constant 1.000000e+00 : f32
    %49 = vector.broadcast %cst_17 : f32 to vector<2x64xf32>
    %50 = arith.addf %49, %48 : vector<2x64xf32>
    %51 = arith.divf %48, %50 : vector<2x64xf32>
    %cst_18 = arith.constant 1.000000e-30 : f32
    %52 = vector.broadcast %cst_18 : f32 to vector<2x64xf32>
    %53 = arith.addf %48, %52 : vector<2x64xf32>
    %54 = math.rsqrt %53 : vector<2x64xf32>
    %55 = arith.mulf %51, %54 : vector<2x64xf32>
    %56 = arith.mulf %55, %46 : vector<2x64xf32>
    %57 = arith.mulf %39, %56 : vector<2x64xf32>
    %cst_19 = arith.constant dense<0.000000e+00> : vector<2x64xf32>
    %58 = tpu.matmul %57, %42, %cst_19 {dimension_numbers = #tpu.dot_dimension_numbers<[1], [0], [0], [1], [0, 0, 1, 1], [], []>} : vector<2x64xf32>, vector<64x64xf32>, vector<2x64xf32> -> vector<2x64xf32>
    %59 = arith.mulf %40, %56 : vector<2x64xf32>
    %cst_20 = arith.constant dense<0.000000e+00> : vector<2x64xf32>
    %60 = tpu.matmul %59, %42, %cst_20 {dimension_numbers = #tpu.dot_dimension_numbers<[1], [0], [0], [1], [0, 0, 1, 1], [], []>} : vector<2x64xf32>, vector<64x64xf32>, vector<2x64xf32> -> vector<2x64xf32>
    %61 = arith.mulf %41, %56 : vector<2x64xf32>
    %cst_21 = arith.constant dense<0.000000e+00> : vector<2x64xf32>
    %62 = tpu.matmul %61, %42, %cst_21 {dimension_numbers = #tpu.dot_dimension_numbers<[1], [0], [0], [1], [0, 0, 1, 1], [], []>} : vector<2x64xf32>, vector<64x64xf32>, vector<2x64xf32> -> vector<2x64xf32>
    %63 = arith.maximumf %58, %60 : vector<2x64xf32>
    %64 = arith.maximumf %63, %62 : vector<2x64xf32>
    %65 = arith.subf %58, %64 : vector<2x64xf32>
    %66 = math.exp %65 : vector<2x64xf32>
    %67 = arith.subf %60, %64 : vector<2x64xf32>
    %68 = math.exp %67 : vector<2x64xf32>
    %69 = arith.subf %62, %64 : vector<2x64xf32>
    %70 = math.exp %69 : vector<2x64xf32>
    %71 = arith.addf %66, %68 : vector<2x64xf32>
    %72 = arith.addf %71, %70 : vector<2x64xf32>
    %73 = tpu.reciprocal %72 {approx = true} : vector<2x64xf32> -> vector<2x64xf32>
    %74 = arith.mulf %66, %39 : vector<2x64xf32>
    %75 = arith.mulf %68, %40 : vector<2x64xf32>
    %76 = arith.addf %74, %75 : vector<2x64xf32>
    %77 = arith.mulf %70, %41 : vector<2x64xf32>
    %78 = arith.addf %76, %77 : vector<2x64xf32>
    %79 = arith.mulf %78, %73 : vector<2x64xf32>
    %80 = arith.mulf %79, %79 : vector<2x64xf32>
    %cst_22 = arith.constant dense<0.000000e+00> : vector<2x64xf32>
    %81 = tpu.matmul %80, %42, %cst_22 {dimension_numbers = #tpu.dot_dimension_numbers<[1], [0], [0], [1], [0, 0, 1, 1], [], []>} : vector<2x64xf32>, vector<64x64xf32>, vector<2x64xf32> -> vector<2x64xf32>
    %cst_23 = arith.constant 1.000000e+00 : f32
    %82 = vector.broadcast %cst_23 : f32 to vector<2x64xf32>
    %83 = arith.addf %82, %81 : vector<2x64xf32>
    %84 = arith.divf %81, %83 : vector<2x64xf32>
    %cst_24 = arith.constant 1.000000e-30 : f32
    %85 = vector.broadcast %cst_24 : f32 to vector<2x64xf32>
    %86 = arith.addf %81, %85 : vector<2x64xf32>
    %87 = math.rsqrt %86 : vector<2x64xf32>
    %88 = arith.mulf %84, %87 : vector<2x64xf32>
    %89 = arith.mulf %88, %79 : vector<2x64xf32>
    %90 = arith.mulf %39, %89 : vector<2x64xf32>
    %cst_25 = arith.constant dense<0.000000e+00> : vector<2x64xf32>
    %91 = tpu.matmul %90, %42, %cst_25 {dimension_numbers = #tpu.dot_dimension_numbers<[1], [0], [0], [1], [0, 0, 1, 1], [], []>} : vector<2x64xf32>, vector<64x64xf32>, vector<2x64xf32> -> vector<2x64xf32>
    %92 = arith.addf %58, %91 : vector<2x64xf32>
    %93 = arith.mulf %40, %89 : vector<2x64xf32>
    %cst_26 = arith.constant dense<0.000000e+00> : vector<2x64xf32>
    %94 = tpu.matmul %93, %42, %cst_26 {dimension_numbers = #tpu.dot_dimension_numbers<[1], [0], [0], [1], [0, 0, 1, 1], [], []>} : vector<2x64xf32>, vector<64x64xf32>, vector<2x64xf32> -> vector<2x64xf32>
    %95 = arith.addf %60, %94 : vector<2x64xf32>
    %96 = arith.mulf %41, %89 : vector<2x64xf32>
    %cst_27 = arith.constant dense<0.000000e+00> : vector<2x64xf32>
    %97 = tpu.matmul %96, %42, %cst_27 {dimension_numbers = #tpu.dot_dimension_numbers<[1], [0], [0], [1], [0, 0, 1, 1], [], []>} : vector<2x64xf32>, vector<64x64xf32>, vector<2x64xf32> -> vector<2x64xf32>
    %98 = arith.addf %62, %97 : vector<2x64xf32>
    %99 = arith.maximumf %92, %95 : vector<2x64xf32>
    %100 = arith.maximumf %99, %98 : vector<2x64xf32>
    %101 = arith.subf %92, %100 : vector<2x64xf32>
    %102 = math.exp %101 : vector<2x64xf32>
    %103 = arith.subf %95, %100 : vector<2x64xf32>
    %104 = math.exp %103 : vector<2x64xf32>
    %105 = arith.subf %98, %100 : vector<2x64xf32>
    %106 = math.exp %105 : vector<2x64xf32>
    %107 = arith.addf %102, %104 : vector<2x64xf32>
    %108 = arith.addf %107, %106 : vector<2x64xf32>
    %109 = tpu.reciprocal %108 {approx = true} : vector<2x64xf32> -> vector<2x64xf32>
    %110 = arith.mulf %102, %39 : vector<2x64xf32>
    %111 = arith.mulf %104, %40 : vector<2x64xf32>
    %112 = arith.addf %110, %111 : vector<2x64xf32>
    %113 = arith.mulf %106, %41 : vector<2x64xf32>
    %114 = arith.addf %112, %113 : vector<2x64xf32>
    %115 = arith.mulf %114, %109 : vector<2x64xf32>
    %116 = vector.extract_strided_slice %115 {offsets = [0, 0], sizes = [2, 8], strides = [1, 1]} : vector<2x64xf32> to vector<2x8xf32>
    %117 = vector.extract_strided_slice %115 {offsets = [0, 8], sizes = [2, 8], strides = [1, 1]} : vector<2x64xf32> to vector<2x8xf32>
    %118 = vector.extract_strided_slice %115 {offsets = [0, 16], sizes = [2, 8], strides = [1, 1]} : vector<2x64xf32> to vector<2x8xf32>
    %119 = vector.extract_strided_slice %115 {offsets = [0, 24], sizes = [2, 8], strides = [1, 1]} : vector<2x64xf32> to vector<2x8xf32>
    %120 = vector.extract_strided_slice %115 {offsets = [0, 32], sizes = [2, 8], strides = [1, 1]} : vector<2x64xf32> to vector<2x8xf32>
    %121 = vector.extract_strided_slice %115 {offsets = [0, 40], sizes = [2, 8], strides = [1, 1]} : vector<2x64xf32> to vector<2x8xf32>
    %122 = vector.extract_strided_slice %115 {offsets = [0, 48], sizes = [2, 8], strides = [1, 1]} : vector<2x64xf32> to vector<2x8xf32>
    %123 = vector.extract_strided_slice %115 {offsets = [0, 56], sizes = [2, 8], strides = [1, 1]} : vector<2x64xf32> to vector<2x8xf32>
    %124 = tpu.concatenate %116, %117, %118, %119, %120, %121, %122, %123 in 0 : vector<2x8xf32>, vector<2x8xf32>, vector<2x8xf32>, vector<2x8xf32>, vector<2x8xf32>, vector<2x8xf32>, vector<2x8xf32>, vector<2x8xf32> -> vector<16x8xf32>
    %125 = arith.truncf %124 : vector<16x8xf32> to vector<16x8xbf16>
    %c0_28 = arith.constant 0 : index
    %c0_29 = arith.constant 0 : index
    %126 = vector.load %arg6[%c0_28, %c0_29] : memref<8x768xbf16, #tpu.memory_space<vmem>>, vector<8x768xbf16>
    %cst_30 = arith.constant dense<0.000000e+00> : vector<16x768xf32>
    %127 = tpu.matmul %125, %126, %cst_30 {dimension_numbers = #tpu.dot_dimension_numbers<[1], [0], [0], [1], [0, 0, 1, 1], [], []>} : vector<16x8xbf16>, vector<8x768xbf16>, vector<16x768xf32> -> vector<16x768xf32>
    %c0_31 = arith.constant 0 : index
    %c0_32 = arith.constant 0 : index
    %128 = vector.load %arg7[%c0_31, %c0_32] : memref<1x768xf32, #tpu.memory_space<vmem>>, vector<1x768xf32>
    %129 = vector.broadcast %128 : vector<1x768xf32> to vector<16x768xf32>
    %130 = arith.addf %127, %129 : vector<16x768xf32>
    %c0_33 = arith.constant 0 : index
    %c0_34 = arith.constant 0 : index
    %131 = vector.load %arg8[%c0_33, %c0_34] : memref<16x768xf32, #tpu.memory_space<vmem>>, vector<16x768xf32>
    tpu.vector_store %arg8[%c0_33, %c0_34], %130 {strides = array<i32>} : memref<16x768xf32, #tpu.memory_space<vmem>>, vector<16x768xf32>,
    return
  }
}

</mosaic_0001>

<bundles_post_ra>
// kernel: capsnet_forward.1
= control target key start
LH: loop header
LB: loop body
LE: loop exit
PB: predicated region body
PF: predicated region fallthrough
CT: control target
= control target key end

     0   :  { %s3143_s0 = inlined_call_operand.vmem [shape: f32[16,768], index: 0, kind: input, shape index: {}]   ;;  %s3144_s1 = inlined_call_operand.vmem [shape: f32[768,32], index: 1, kind: input, shape index: {}]   ;;  %s3145_s2 = inlined_call_operand.vmem [shape: f32[1,32], index: 2, kind: input, shape index: {}]   ;;  %s3146_s3 = inlined_call_operand.vmem [shape: f32[32,24], index: 3, kind: input, shape index: {}]   ;;  %s3147_s4 = inlined_call_operand.vmem [shape: f32[192,192], index: 4, kind: input, shape index: {}]   ;;  %s3148_s5 = inlined_call_operand.vmem [shape: f32[64,64], index: 5, kind: input, shape index: {}]   ;;  %s3149_s6 = inlined_call_operand.vmem [shape: bf16[8,768], index: 6, kind: input, shape index: {}]   ;;  %s3150_s7 = inlined_call_operand.vmem [shape: f32[1,768], index: 7, kind: input, shape index: {}]   ;;  %s3151_s8 = inlined_call_operand.hbm [shape: f32[16,768], index: 8, kind: output, shape index: {}]  }
   0x1   :  { %v59_v0 = vld [vmem:[%s3144_s1 + $0x80] sm:$0xff]  ;;  %v60_v1 = vld [vmem:[%s3144_s1 + $0x88] sm:$0xff]  ;;  %v61_v11 = vld [vmem:[%s3144_s1 + $0x90] sm:$0xff] }
   0x2   :  { %v43_v2 = vld [vmem:[%s3144_s1] sm:$0xff]  ;;  %v2003_v3 = vpack.c.bf16 %v60_v1, %v59_v0  ;;  %v44_v4 = vld [vmem:[%s3144_s1 + $0x8] sm:$0xff]  ;;  %v62_v13 = vld [vmem:[%s3144_s1 + $0x98] sm:$0xff] }
   0x3   :  { %v91_v5 = vld [vmem:[%s3144_s1 + $0x180] sm:$0xff]  ;;  %v92_v6 = vld [vmem:[%s3144_s1 + $0x188] sm:$0xff]  ;;  %v2005_v7 = vpack.c.bf16 %v44_v4, %v43_v2  ;;  %v45_v14 = vld [vmem:[%s3144_s1 + $0x10] sm:$0xff]  ;;  %v2007_v16 = vpack.c.bf16 %v62_v13, %v61_v11 }
   0x4   :  { %v2035_v8 = vpack.c.bf16 %v92_v6, %v91_v5  ;;  %v75_v9 = vld [vmem:[%s3144_s1 + $0x100] sm:$0xff]  ;;  %v76_v10 = vld [vmem:[%s3144_s1 + $0x108] sm:$0xff]  ;;  %2004 = vmatprep.subr.bf16.mxu0 %v2003_v3  ;;  %v46_v15 = vld [vmem:[%s3144_s1 + $0x18] sm:$0xff] }
   0x5   :  { %v2037_v12 = vpack.c.bf16 %v76_v10, %v75_v9  ;;  %2006 = vmatpush3.bf16.msra.mxu0 %v2005_v7  ;;  %v2009_v17 = vpack.c.bf16 %v46_v15, %v45_v14  ;;  %v93_v18 = vld [vmem:[%s3144_s1 + $0x190] sm:$0xff]  ;;  %v94_v19 = vld [vmem:[%s3144_s1 + $0x198] sm:$0xff]  ;;  %v63_v23 = vld [vmem:[%s3144_s1 + $0xa0] sm:$0xff] }
   0x6   :  { %2036 = vmatprep.subr.bf16.mxu1 %v2035_v8  ;;  %v77_v20 = vld [vmem:[%s3144_s1 + $0x110] sm:$0xff]  ;;  %v2039_v21 = vpack.c.bf16 %v94_v19, %v93_v18  ;;  %v78_v22 = vld [vmem:[%s3144_s1 + $0x118] sm:$0xff]  ;;  %v64_v24 = vld [vmem:[%s3144_s1 + $0xa8] sm:$0xff]  ;;  %2008 = vmatprep.subr.bf16.mxu0 %v2007_v16 }
   0x7   :  { %2038 = vmatpush3.bf16.msra.mxu1 %v2037_v12  ;;  %v2041_v25 = vpack.c.bf16 %v78_v22, %v77_v20  ;;  %v2011_v26 = vpack.c.bf16 %v64_v24, %v63_v23  ;;  %v47_v27 = vld [vmem:[%s3144_s1 + $0x20] sm:$0xff]  ;;  %v48_v28 = vld [vmem:[%s3144_s1 + $0x28] sm:$0xff]  ;;  %v65_v35 = vld [vmem:[%s3144_s1 + $0xb0] sm:$0xff] }
   0x8   :  { %v95_v29 = vld [vmem:[%s3144_s1 + $0x1a0] sm:$0xff]  ;;  %2040 = vmatprep.subr.bf16.mxu1 %v2039_v21  ;;  %v96_v30 = vld [vmem:[%s3144_s1 + $0x1a8] sm:$0xff]  ;;  %v2013_v33 = vpack.c.bf16 %v48_v28, %v47_v27  ;;  %v66_v36 = vld [vmem:[%s3144_s1 + $0xb8] sm:$0xff] }
   0x9   :  { %v79_v31 = vld [vmem:[%s3144_s1 + $0x120] sm:$0xff]  ;;  %v80_v32 = vld [vmem:[%s3144_s1 + $0x128] sm:$0xff]  ;;  %2010 = vmatpush3.bf16.msra.mxu0 %v2009_v17  ;;  %v2043_v34 = vpack.c.bf16 %v96_v30, %v95_v29  ;;  %v49_v37 = vld [vmem:[%s3144_s1 + $0x30] sm:$0xff]  ;;  %v2015_v39 = vpack.c.bf16 %v66_v36, %v65_v35 }
   0xa   :  { %2012 = vmatprep.subr.bf16.mxu0 %v2011_v26  ;;  %v2045_v38 = vpack.c.bf16 %v80_v32, %v79_v31  ;;  %v50_v40 = vld [vmem:[%s3144_s1 + $0x38] sm:$0xff]  ;;  %v97_v41 = vld [vmem:[%s3144_s1 + $0x1b0] sm:$0xff]  ;;  %v67_v46 = vld [vmem:[%s3144_s1 + $0xc0] sm:$0xff] }
   0xb   :  { %2042 = vmatpush3.bf16.msra.mxu1 %v2041_v25  ;;  %v98_v42 = vld [vmem:[%s3144_s1 + $0x1b8] sm:$0xff]  ;;  %v81_v44 = vld [vmem:[%s3144_s1 + $0x130] sm:$0xff]  ;;  %v68_v47 = vld [vmem:[%s3144_s1 + $0xc8] sm:$0xff]  ;;  %v2017_v48 = vpack.c.bf16 %v50_v40, %v49_v37 }
   0xc   :  { %2044 = vmatprep.subr.bf16.mxu1 %v2043_v34  ;;  %v2047_v43 = vpack.c.bf16 %v98_v42, %v97_v41  ;;  %v82_v45 = vld [vmem:[%s3144_s1 + $0x138] sm:$0xff]  ;;  %v99_v49 = vld [vmem:[%s3144_s1 + $0x1c0] sm:$0xff]  ;;  %v100_v50 = vld [vmem:[%s3144_s1 + $0x1c8] sm:$0xff]  ;;  %v2019_v52 = vpack.c.bf16 %v68_v47, %v67_v46 }
   0xd   :  { %2014 = vmatpush3.bf16.msra.mxu0 %v2013_v33  ;;  %v2049_v51 = vpack.c.bf16 %v82_v45, %v81_v44  ;;  %v51_v53 = vld [vmem:[%s3144_s1 + $0x40] sm:$0xff]  ;;  %v52_v54 = vld [vmem:[%s3144_s1 + $0x48] sm:$0xff]  ;;  %v2051_v56 = vpack.c.bf16 %v100_v50, %v99_v49  ;;  %v69_v58 = vld [vmem:[%s3144_s1 + $0xd0] sm:$0xff] }
   0xe   :  { %2016 = vmatprep.subr.bf16.mxu0 %v2015_v39  ;;  %v83_v55 = vld [vmem:[%s3144_s1 + $0x140] sm:$0xff]  ;;  %v84_v57 = vld [vmem:[%s3144_s1 + $0x148] sm:$0xff]  ;;  %v70_v59 = vld [vmem:[%s3144_s1 + $0xd8] sm:$0xff]  ;;  %v2021_v62 = vpack.c.bf16 %v52_v54, %v51_v53 }
   0xf   :  { %2046 = vmatpush3.bf16.msra.mxu1 %v2045_v38  ;;  %v101_v60 = vld [vmem:[%s3144_s1 + $0x1d0] sm:$0xff]  ;;  %v102_v61 = vld [vmem:[%s3144_s1 + $0x1d8] sm:$0xff]  ;;  %v2053_v63 = vpack.c.bf16 %v84_v57, %v83_v55  ;;  %v2023_v0 = vpack.c.bf16 %v70_v59, %v69_v58  ;;  %v71_v6 = vld [vmem:[%s3144_s1 + $0xe0] sm:$0xff] }
  0x10   :  { %2048 = vmatprep.subr.bf16.mxu1 %v2047_v43  ;;  %v53_v1 = vld [vmem:[%s3144_s1 + $0x50] sm:$0xff]  ;;  %v54_v2 = vld [vmem:[%s3144_s1 + $0x58] sm:$0xff]  ;;  %v2055_v4 = vpack.c.bf16 %v102_v61, %v101_v60  ;;  %v72_v7 = vld [vmem:[%s3144_s1 + $0xe8] sm:$0xff] }
  0x11   :  { %2018 = vmatpush3.bf16.msra.mxu0 %v2017_v48  ;;  %v85_v3 = vld [vmem:[%s3144_s1 + $0x150] sm:$0xff]  ;;  %v86_v5 = vld [vmem:[%s3144_s1 + $0x158] sm:$0xff]  ;;  %v103_v8 = vld [vmem:[%s3144_s1 + $0x1e0] sm:$0xff]  ;;  %v2025_v10 = vpack.c.bf16 %v54_v2, %v53_v1  ;;  %v2027_v14 = vpack.c.bf16 %v72_v7, %v71_v6 }
  0x12   :  { %2020 = vmatprep.subr.bf16.mxu0 %v2019_v52  ;;  %v104_v9 = vld [vmem:[%s3144_s1 + $0x1e8] sm:$0xff]  ;;  %v55_v11 = vld [vmem:[%s3144_s1 + $0x60] sm:$0xff]  ;;  %v2057_v13 = vpack.c.bf16 %v86_v5, %v85_v3  ;;  %v73_v19 = vld [vmem:[%s3144_s1 + $0xf0] sm:$0xff] }
  0x13   :  { %2050 = vmatpush3.bf16.msra.mxu1 %v2049_v51  ;;  %v32_v12 = vld [vmem:[%s3143_s0 + $0x8] sm:$0xff]  ;;  %v87_v16 = vld [vmem:[%s3144_s1 + $0x160] sm:$0xff]  ;;  %v2059_v18 = vpack.c.bf16 %v104_v9, %v103_v8  ;;  %v74_v20 = vld [vmem:[%s3144_s1 + $0xf8] sm:$0xff] }
  0x14   :  { %2052 = vmatprep.subr.bf16.mxu1 %v2051_v56  ;;  %v56_v15 = vld [vmem:[%s3144_s1 + $0x68] sm:$0xff]  ;;  %210 = vmatprep.mubr.f32.mxu0 %v32_v12  ;;  %v34_v21 = vld [vmem:[%s3143_s0 + $0x18] sm:$0xff]  ;;  %v105_v22 = vld [vmem:[%s3144_s1 + $0x1f0] sm:$0xff]  ;;  %v2031_v26 = vpack.c.bf16 %v74_v20, %v73_v19 }
  0x15   :  { %2022 = vmatpush3.bf16.msra.mxu0 %v2021_v62  ;;  %v88_v17 = vld [vmem:[%s3144_s1 + $0x168] sm:$0xff]  ;;  %v106_v23 = vld [vmem:[%s3144_s1 + $0x1f8] sm:$0xff]  ;;  %285 = vmatprep.mubr.f32.mxu1 %v34_v21  ;;  %v2029_v24 = vpack.c.bf16 %v56_v15, %v55_v11  ;;  %v57_v27 = vld [vmem:[%s3144_s1 + $0x70] sm:$0xff] }
  0x16   :  { %2024 = vmatprep.subr.bf16.mxu0 %v2023_v0  ;;  %v2061_v25 = vpack.c.bf16 %v88_v17, %v87_v16  ;;  %v58_v28 = vld [vmem:[%s3144_s1 + $0x78] sm:$0xff]  ;;  %v89_v29 = vld [vmem:[%s3144_s1 + $0x170] sm:$0xff]  ;;  %v2063_v30 = vpack.c.bf16 %v106_v23, %v105_v22  ;;  %v123_v32 = vld [vmem:[%s3144_s1 + $0x280] sm:$0xff] }
  0x17   :  { %2054 = vmatpush3.bf16.msra.mxu1 %v2053_v63  ;;  %v90_v31 = vld [vmem:[%s3144_s1 + $0x178] sm:$0xff]  ;;  %v124_v33 = vld [vmem:[%s3144_s1 + $0x288] sm:$0xff]  ;;  %v2033_v34 = vpack.c.bf16 %v58_v28, %v57_v27  ;;  %v107_v37 = vld [vmem:[%s3144_s1 + $0x200] sm:$0xff] }
  0x18   :  { %2056 = vmatprep.subr.bf16.mxu1 %v2055_v4  ;;  %v2065_v35 = vpack.c.bf16 %v90_v31, %v89_v29  ;;  %v2067_v36 = vpack.c.bf16 %v124_v33, %v123_v32  ;;  %v108_v38 = vld [vmem:[%s3144_s1 + $0x208] sm:$0xff]  ;;  %v125_v39 = vld [vmem:[%s3144_s1 + $0x290] sm:$0xff]  ;;  %v126_v40 = vld [vmem:[%s3144_s1 + $0x298] sm:$0xff] }
  0x19   :  { %2026 = vmatpush3.bf16.msra.mxu0 %v2025_v10  ;;  %v31_v41 = vld [vmem:[%s3143_s0] sm:$0xff]  ;;  %v2069_v42 = vpack.c.bf16 %v108_v38, %v107_v37  ;;  %v33_v43 = vld [vmem:[%s3143_s0 + $0x10] sm:$0xff]  ;;  %v2071_v44 = vpack.c.bf16 %v126_v40, %v125_v39  ;;  %v110_v46 = vld [vmem:[%s3144_s1 + $0x218] sm:$0xff] }
  0x1a   :  { %2028 = vmatprep.subr.bf16.mxu0 %v2027_v14  ;;  %v109_v45 = vld [vmem:[%s3144_s1 + $0x210] sm:$0xff]  ;;  %v127_v47 = vld [vmem:[%s3144_s1 + $0x2a0] sm:$0xff]  ;;  %v128_v48 = vld [vmem:[%s3144_s1 + $0x2a8] sm:$0xff] }
  0x1b   :  { %2058 = vmatpush3.bf16.msra.mxu1 %v2057_v13  ;;  %v38_v49 = vld [vmem:[%s3143_s0 + $0x38] sm:$0xff]  ;;  %v40_v50 = vld [vmem:[%s3143_s0 + $0x48] sm:$0xff]  ;;  %v2073_v51 = vpack.c.bf16 %v110_v46, %v109_v45  ;;  %v37_v52 = vld [vmem:[%s3143_s0 + $0x30] sm:$0xff] }
  0x1c   :  { %2060 = vmatprep.subr.bf16.mxu1 %v2059_v18 }
  0x1d   :  { %2030 = vmatpush3.bf16.msra.mxu0 %v2029_v24 }
  0x1e   :  { %2032 = vmatprep.subr.bf16.mxu0 %v2031_v26 }
  0x1f   :  { %2062 = vmatpush3.bf16.msra.mxu1 %v2061_v25 }
  0x20   :  { %2064 = vmatprep.subr.bf16.mxu1 %v2063_v30 }
  0x21   :  { %2034 = vmatpush3.bf16.msra.mxu0 %v2033_v34 }
  0x22   :  { %2068 = vmatprep.subr.bf16.mxu0 %v2067_v36 }
  0x23   :  { %2066 = vmatpush3.bf16.msra.mxu1 %v2065_v35 }
  0x24   :  { %211 = vmatmul.mubr.f32.vlgmr.msra.gmra.mrb[0].mxu0 %v31_v41 }
  0x25   :  { %2070 = vmatpush3.bf16.msra.mxu0 %v2069_v42 }
  0x26   :  { %286 = vmatmul.mubr.f32.vlgmr.msra.gmra.mrb[0].mxu1 %v33_v43 }
  0x27   :  { %13 = vsyncpa [#allocation3], 0  ;;  %2072 = vmatprep.subr.bf16.mxu0 %v2071_v44  ;;  %v2075_v53 = vpack.c.bf16 %v128_v48, %v127_v47  ;;  %v111_v54 = vld [vmem:[%s3144_s1 + $0x220] sm:$0xff]  ;;  %v112_v55 = vld [vmem:[%s3144_s1 + $0x228] sm:$0xff]  ;;  %215 = vmatprep.mubr.f32.mxu0 %v38_v49  ;;  %vm377_vm0 = vcmask 261120   ;;  %s2351_s13 = smov 16  }
  0x28   :  { %v39_v56 = vld [vmem:[%s3143_s0 + $0x40] sm:$0xff]  ;;  %v129_v57 = vld [vmem:[%s3144_s1 + $0x2b0] sm:$0xff]  ;;  %v130_v58 = vld [vmem:[%s3144_s1 + $0x2b8] sm:$0xff]  ;;  %290 = vmatprep.mubr.f32.mxu1 %v40_v50  ;;  %216 = vmatmul.mubr.f32.gmra.mrb[2].mxu0 %v37_v52  ;;  %v2077_v60 = vpack.c.bf16 %v112_v55, %v111_v54  ;;  %s2352_s14 = smov 120   ;;  %s2354_s23 = smov 72   ;;  %vm512_vm1 = vcmask 130048  }
  0x29   :  { %v36_v59 = vld [vmem:[%s3143_s0 + $0x28] sm:$0xff]  ;;  %2074 = vmatpush3.bf16.msra.mxu0 %v2073_v51  ;;  %v2079_v61 = vpack.c.bf16 %v130_v58, %v129_v57  ;;  %v113_v62 = vld [vmem:[%s3144_s1 + $0x230] sm:$0xff]  ;;  %v114_v63 = vld [vmem:[%s3144_s1 + $0x238] sm:$0xff]  ;;  %s2355_s28 = smov 96   ;;  %s2356_s29 = smov 24   ;;  %vm514_vm2 = vcmask 326656  }
  0x2a   :  { %291 = vmatmul.mubr.f32.gmra.mrb[2].mxu1 %v39_v56  ;;  %2076 = vmatprep.subr.bf16.mxu0 %v2075_v53  ;;  %v131_v0 = vld [vmem:[%s3144_s1 + $0x2c0] sm:$0xff]  ;;  %v132_v1 = vld [vmem:[%s3144_s1 + $0x2c8] sm:$0xff]  ;;  %v2081_v2 = vpack.c.bf16 %v114_v63, %v113_v62  ;;  %v133_v6 = vld [vmem:[%s3144_s1 + $0x2d0] sm:$0xff]  ;;  %vm502_vm3 = vcmask 195584   ;;  %vm504_vm4 = vcmask 392192   ;;  %vm506_vm5 = vcmask 588800  }
  0x2b   :  { %360 = vmatprep.mubr.f32.mxu0 %v36_v59  ;;  %v2083_v3 = vpack.c.bf16 %v132_v1, %v131_v0  ;;  %v115_v4 = vld [vmem:[%s3144_s1 + $0x240] sm:$0xff]  ;;  %v116_v5 = vld [vmem:[%s3144_s1 + $0x248] sm:$0xff]  ;;  %v134_v7 = vld [vmem:[%s3144_s1 + $0x2d8] sm:$0xff]  ;;  %vm508_vm6 = vcmask 785408   ;;  %vm510_vm7 = vcmask 982016   ;;  %vm558_vm8 = vcmask 1040384  }
  0x2c   :  { %v2085_v8 = vpack.c.bf16 %v116_v5, %v115_v4  ;;  %v2087_v9 = vpack.c.bf16 %v134_v7, %v133_v6  ;;  %v117_v10 = vld [vmem:[%s3144_s1 + $0x250] sm:$0xff]  ;;  %v118_v11 = vld [vmem:[%s3144_s1 + $0x258] sm:$0xff]  ;;  %v135_v12 = vld [vmem:[%s3144_s1 + $0x2e0] sm:$0xff]  ;;  %vm609_vm9 = vcmask 523264   ;;  %vm2359_vm10 = vmmov 0  }
  0x2d   :  { %2078 = vmatpush3.bf16.msra.mxu0 %v2077_v60  ;;  %v136_v13 = vld [vmem:[%s3144_s1 + $0x2e8] sm:$0xff]  ;;  %v2089_v14 = vpack.c.bf16 %v118_v11, %v117_v10  ;;  %v119_v16 = vld [vmem:[%s3144_s1 + $0x260] sm:$0xff]  ;;  %v137_v18 = vld [vmem:[%s3144_s1 + $0x2f0] sm:$0xff]  ;;  %vm1387_vm11 = vcmask 1043456   ;;  %vm1385_vm12 = vcmask 1041408   ;;  %vm1389_vm13 = vcmask 1045504  }
  0x2e   :  { %2080 = vmatprep.subr.bf16.mxu0 %v2079_v61  ;;  %v2091_v15 = vpack.c.bf16 %v136_v13, %v135_v12  ;;  %v120_v17 = vld [vmem:[%s3144_s1 + $0x268] sm:$0xff]  ;;  %v138_v19 = vld [vmem:[%s3144_s1 + $0x2f8] sm:$0xff]  ;;  %v121_v22 = vld [vmem:[%s3144_s1 + $0x270] sm:$0xff]  ;;  %vm1445_vm14 = vcmask 64512  }
  0x2f   :  { %v2093_v20 = vpack.c.bf16 %v120_v17, %v119_v16  ;;  %v2095_v21 = vpack.c.bf16 %v138_v19, %v137_v18  ;;  %v122_v23 = vld [vmem:[%s3144_s1 + $0x278] sm:$0xff]  ;;  %v35_v25 = vld [vmem:[%s3143_s0 + $0x20] sm:$0xff]  ;;  %v41_v27 = vld [vmem:[%s3143_s0 + $0x50] sm:$0xff]  ;;  %s2353_s1 = smov 40  }
  0x30   :  { %v2097_v24 = vpack.c.bf16 %v122_v23, %v121_v22  ;;  %v42_v26 = vld [vmem:[%s3143_s0 + $0x58] sm:$0xff]  ;;  %v373_v28 = vld [vmem:[%s3146_s3] sm:$0xff]  ;;  %v374_v29 = vld [vmem:[%s3146_s3 + $0x8] sm:$0xff]  ;;  %s2365_s0 = smov 104  }
  0x31   :  { %2082 = vmatpush3.bf16.msra.mxu0 %v2081_v2  ;;  %v2099_v30 = vpack.c.bf16 %v374_v29, %v373_v28  ;;  %v375_v31 = vld [vmem:[%s3146_s3 + $0x10] sm:$0xff]  ;;  %v376_v32 = vld [vmem:[%s3146_s3 + $0x18] sm:$0xff]  ;;  %v1624_v35 = vld [vmem:[%s3145_s2] ss:$0 sm:$0xff] }
  0x32   :  { %2084 = vmatprep.subr.bf16.mxu0 %v2083_v3  ;;  %v2103_v33 = vpack.c.bf16 %v376_v32, %v375_v31  ;;  %v562_v61 = vld [vmem:[%s3147_s4 + $0x8] sm:$0xff]  ;;  %v564_v62 = vld [vmem:[%s3147_s4 + $0x18] sm:$0xff]  ;;  %v561_v63 = vld [vmem:[%s3147_s4] sm:$0xff] }
  0x33   :  { %2100 = vmatprep.subr.bf16.mxu1 %v2099_v30  ;;  %v2107_v0 = vpack.c.bf16 %v564_v62, %v562_v61  ;;  %v563_v1 = vld [vmem:[%s3147_s4 + $0x10] sm:$0xff]  ;;  %v566_v2 = vld [vmem:[%s3147_s4 + $0x28] sm:$0xff]  ;;  %v568_v3 = vld [vmem:[%s3147_s4 + $0x38] sm:$0xff] }
  0x34   :  { %2102 = vmatpush3.bf16.msra.mxu1 %v2099_v30  ;;  %v2109_v4 = vpack.c.bf16 %v563_v1, %v561_v63  ;;  %v2111_v5 = vpack.c.bf16 %v568_v3, %v566_v2  ;;  %v565_v6 = vld [vmem:[%s3147_s4 + $0x20] sm:$0xff]  ;;  %v567_v7 = vld [vmem:[%s3147_s4 + $0x30] sm:$0xff]  ;;  %v586_v32 = vld [vmem:[%s3147_s4 + $0xc8] sm:$0xff] }
  0x35   :  { %2086 = vmatpush3.bf16.msra.mxu0 %v2085_v8  ;;  %2104 = vmatprep.subr.bf16.mxu1 %v2103_v33  ;;  %v570_v8 = vld [vmem:[%s3147_s4 + $0x48] sm:$0xff]  ;;  %v2113_v10 = vpack.c.bf16 %v567_v7, %v565_v6  ;;  %v569_v12 = vld [vmem:[%s3147_s4 + $0x40] sm:$0xff]  ;;  %v571_v13 = vld [vmem:[%s3147_s4 + $0x50] sm:$0xff] }
  0x36   :  { %2088 = vmatprep.subr.bf16.mxu0 %v2087_v9  ;;  %v572_v9 = vld [vmem:[%s3147_s4 + $0x58] sm:$0xff]  ;;  %v2117_v16 = vpack.c.bf16 %v571_v13, %v569_v12  ;;  %v573_v18 = vld [vmem:[%s3147_s4 + $0x60] sm:$0xff]  ;;  %v575_v19 = vld [vmem:[%s3147_s4 + $0x70] sm:$0xff] }
  0x37   :  { %v2115_v11 = vpack.c.bf16 %v572_v9, %v570_v8  ;;  %v2121_v22 = vpack.c.bf16 %v575_v19, %v573_v18  ;;  %v581_v30 = vld [vmem:[%s3147_s4 + $0xa0] sm:$0xff]  ;;  %v583_v31 = vld [vmem:[%s3147_s4 + $0xb0] sm:$0xff]  ;;  %v598_v2 = vld [vmem:[%s3147_s4 + $0x128] sm:$0xff] }
  0x38   :  { %2106 = vmatpush3.bf16.msra.mxu1 %v2103_v33  ;;  %v588_v33 = vld [vmem:[%s3147_s4 + $0xd8] sm:$0xff]  ;;  %v597_v7 = vld [vmem:[%s3147_s4 + $0x120] sm:$0xff]  ;;  %v599_v8 = vld [vmem:[%s3147_s4 + $0x130] sm:$0xff] }
  0x39   :  { %2090 = vmatpush3.bf16.msra.mxu0 %v2089_v14  ;;  %2108 = vmatprep.subr.bf16.mxu1 %v2107_v0  ;;  %v574_v14 = vld [vmem:[%s3147_s4 + $0x68] sm:$0xff]  ;;  %v600_v3 = vld [vmem:[%s3147_s4 + $0x138] sm:$0xff]  ;;  %v2145_v9 = vpack.c.bf16 %v599_v8, %v597_v7 }
  0x3a   :  { %2092 = vmatprep.subr.bf16.mxu0 %v2091_v15  ;;  %v576_v15 = vld [vmem:[%s3147_s4 + $0x78] sm:$0xff]  ;;  %v2143_v6 = vpack.c.bf16 %v600_v3, %v598_v2  ;;  %v602_v13 = vld [vmem:[%s3147_s4 + $0x148] sm:$0xff] }
  0x3b   :  { %v2119_v17 = vpack.c.bf16 %v576_v15, %v574_v14  ;;  %v604_v14 = vld [vmem:[%s3147_s4 + $0x158] sm:$0xff]  ;;  %v601_v15 = vld [vmem:[%s3147_s4 + $0x140] sm:$0xff] }
  0x3d   :  { %2094 = vmatpush3.bf16.msra.mxu0 %v2093_v20  ;;  %v578_v20 = vld [vmem:[%s3147_s4 + $0x88] sm:$0xff] }
  0x3e   :  { %2096 = vmatprep.subr.bf16.mxu0 %v2095_v21  ;;  %v580_v21 = vld [vmem:[%s3147_s4 + $0x98] sm:$0xff] }
  0x3f   :  { %v2123_v23 = vpack.c.bf16 %v580_v21, %v578_v20 }
  0x41   :  { %2098 = vmatpush3.bf16.msra.mxu0 %v2097_v24  ;;  %v577_v24 = vld [vmem:[%s3147_s4 + $0x80] sm:$0xff] }
  0x44   :  { %361 = vmatmul.mubr.f32.vlgmr.msra.gmra.mrb[4].mxu0 %v35_v25  ;;  %v579_v25 = vld [vmem:[%s3147_s4 + $0x90] sm:$0xff] }
  0x45   :  { %365 = vmatprep.mubr.f32.mxu0 %v42_v26  ;;  %v582_v26 = vld [vmem:[%s3147_s4 + $0xa8] sm:$0xff]  ;;  %v2125_v28 = vpack.c.bf16 %v579_v25, %v577_v24 }
  0x46   :  { %v606_v25 = vld [vmem:[%s3147_s4 + $0x168] sm:$0xff] }
  0x48   :  { %366 = vmatmul.mubr.f32.gmra.mrb[6].mxu0 %v41_v27  ;;  %v584_v27 = vld [vmem:[%s3147_s4 + $0xb8] sm:$0xff] }
  0x49   :  { %v2127_v29 = vpack.c.bf16 %v584_v27, %v582_v26  ;;  %v608_v26 = vld [vmem:[%s3147_s4 + $0x178] sm:$0xff] }
  0x4a   :  { %v2151_v27 = vpack.c.bf16 %v608_v26, %v606_v25 }
  0xf7   :  { %v1680_v34 = vpop.f32.mrb[0].mxu0 }
  0xf8   :  { %v1681_v36 = vpop.f32.mrb[1].mxu0 }
  0xf9   :  { %v1718_v37 = vpop.f32.mrb[0].mxu1  ;;  %v1682_v38 = vadd.f32 %v1681_v36, %v1680_v34  ;;  %v2129_v34 = vpack.c.bf16 %v583_v31, %v581_v30  ;;  %v585_v36 = vld [vmem:[%s3147_s4 + $0xc0] sm:$0xff] }
  0xfa   :  { %v1719_v39 = vpop.f32.mrb[1].mxu1 }
  0xfb   :  { %v1720_v40 = vadd.f32 %v1719_v39, %v1718_v37  ;;  %v213_v41 = vadd.f32 %v1682_v38, %v1624_v35  ;;  %v1683_v42 = vpop.f32.mrb[2].mxu0  ;;  %v587_v37 = vld [vmem:[%s3147_s4 + $0xd0] sm:$0xff] }
  0xfc   :  { %v1684_v43 = vpop.f32.mrb[3].mxu0  ;;  %v2133_v38 = vpack.c.bf16 %v587_v37, %v585_v36 }
  0xfd   :  { %v1721_v44 = vpop.f32.mrb[2].mxu1  ;;  %v288_v45 = vadd.f32 %v1720_v40, %v213_v41  ;;  %v1685_v46 = vadd.f32 %v1684_v43, %v1683_v42 }
  0xfe   :  { %v1722_v47 = vpop.f32.mrb[3].mxu1 }
  0xff   :  { %v1723_v48 = vadd.f32 %v1722_v47, %v1721_v44  ;;  %v218_v49 = vadd.f32 %v1685_v46, %v1624_v35  ;;  %v2131_v35 = vpack.c.bf16 %v588_v33, %v586_v32  ;;  %v592_v46 = vld [vmem:[%s3147_s4 + $0xf8] sm:$0xff]  ;;  %v589_v47 = vld [vmem:[%s3147_s4 + $0xe0] sm:$0xff] }
 0x101   :  { %v293_v50 = vadd.f32 %v1723_v48, %v218_v49  ;;  %v591_v49 = vld [vmem:[%s3147_s4 + $0xf0] sm:$0xff] }
 0x117   :  { %v1756_v51 = vpop.f32.mrb[4].mxu0 }
 0x118   :  { %v1757_v52 = vpop.f32.mrb[5].mxu0 }
 0x119   :  { %v1758_v53 = vadd.f32 %v1757_v52, %v1756_v51  ;;  %v594_v52 = vld [vmem:[%s3147_s4 + $0x108] sm:$0xff] }
 0x11b   :  { %v2753_v54 = vadd.f32 %v1758_v53, %v288_v45  ;;  %v1759_v55 = vpop.f32.mrb[6].mxu0  ;;  %v590_v45 = vld [vmem:[%s3147_s4 + $0xe8] sm:$0xff]  ;;  %v596_v53 = vld [vmem:[%s3147_s4 + $0x118] sm:$0xff] }
 0x11c   :  { %v1760_v56 = vpop.f32.mrb[7].mxu0  ;;  %v2135_v48 = vpack.c.bf16 %v592_v46, %v590_v45 }
 0x11d   :  { %v371_v57 = vmul.f32 %v2753_v54, %v2753_v54  ;;  %v1761_v58 = vadd.f32 %v1760_v56, %v1759_v55 }
 0x11f   :  { %v2757_v59 = vadd.f32 %v1761_v58, %v293_v50  ;;  %1848 = vmatprep.mubr.msk.f32.mxu1 %vm377_vm0, %v371_v57  ;;  %v2137_v50 = vpack.c.bf16 %v591_v49, %v589_v47  ;;  %v2139_v57 = vpack.c.bf16 %v596_v53, %v594_v52  ;;  %v593_v58 = vld [vmem:[%s3147_s4 + $0x100] sm:$0xff] }
 0x121   :  { %v372_v60 = vmul.f32 %v2757_v59, %v2757_v59 }
 0x123   :  { %1849 = vmatmul.mubr.msk.f32.vlgmr.msra.gmra.mrb[4].mxu1 %vm377_vm0, %v372_v60  ;;  %v595_v60 = vld [vmem:[%s3147_s4 + $0x110] sm:$0xff] }
 0x124   :  { %2110 = vmatpush1.bf16.msra.mxu1 %v2109_v4  ;;  %v2141_v62 = vpack.c.bf16 %v595_v60, %v593_v58 }
 0x125   :  { %2112 = vmatprep.subr.bf16.mxu1 %v2111_v5 }
 0x128   :  { %2114 = vmatpush1.bf16.msra.mxu1 %v2113_v10 }
 0x129   :  { %2116 = vmatprep.subr.bf16.mxu1 %v2115_v11 }
 0x12c   :  { %2118 = vmatpush1.bf16.msra.mxu1 %v2117_v16  ;;  %v603_v16 = vld [vmem:[%s3147_s4 + $0x150] sm:$0xff] }
 0x12d   :  { %2120 = vmatprep.subr.bf16.mxu1 %v2119_v17  ;;  %v2149_v24 = vpack.c.bf16 %v603_v16, %v601_v15  ;;  %v687_v16 = vld [vmem:[%s3148_s5 + $0x18] sm:$0xff] }
 0x130   :  { %2122 = vmatpush1.bf16.msra.mxu1 %v2121_v22 }
 0x131   :  { %2124 = vmatprep.subr.bf16.mxu1 %v2123_v23  ;;  %v2147_v23 = vpack.c.bf16 %v604_v14, %v602_v13  ;;  %v685_v13 = vld [vmem:[%s3148_s5 + $0x8] sm:$0xff]  ;;  %v686_v14 = vld [vmem:[%s3148_s5 + $0x10] sm:$0xff] }
 0x134   :  { %2126 = vmatpush1.bf16.msra.mxu1 %v2125_v28  ;;  %v605_v28 = vld [vmem:[%s3147_s4 + $0x160] sm:$0xff] }
 0x135   :  { %2128 = vmatprep.subr.bf16.mxu1 %v2127_v29  ;;  %v607_v29 = vld [vmem:[%s3147_s4 + $0x170] sm:$0xff]  ;;  %s2357_s4 = smov 48  }
 0x138   :  { %2130 = vmatpush1.bf16.msra.mxu1 %v2129_v34  ;;  %v2153_v34 = vpack.c.bf16 %v607_v29, %v605_v28 }
 0x139   :  { %2132 = vmatprep.subr.bf16.mxu1 %v2131_v35 }
 0x13c   :  { %2134 = vmatpush1.bf16.msra.mxu1 %v2133_v38 }
 0x13d   :  { %2136 = vmatprep.subr.bf16.mxu1 %v2135_v48 }
 0x140   :  { %2138 = vmatpush1.bf16.msra.mxu1 %v2137_v50 }
 0x141   :  { %2140 = vmatprep.subr.bf16.mxu1 %v2139_v57 }
 0x144   :  { %2142 = vmatpush1.bf16.msra.mxu1 %v2141_v62 }
 0x145   :  { %2144 = vmatprep.subr.bf16.mxu1 %v2143_v6 }
 0x148   :  { %2146 = vmatpush1.bf16.msra.mxu1 %v2145_v9 }
 0x149   :  { %2148 = vmatprep.subr.bf16.mxu1 %v2147_v23 }
 0x14c   :  { %2150 = vmatpush1.bf16.msra.mxu1 %v2149_v24  ;;  %v2360_v24 = vmov 0.0  }
 0x14d   :  { %2152 = vmatprep.subr.bf16.mxu1 %v2151_v27  ;;  %1867 = vmatprep.mubr.msk.f32.mxu0 %vm2359_vm10, %v2360_v24 }
 0x150   :  { %2154 = vmatpush1.bf16.msra.mxu1 %v2153_v34 }
 0x1f6   :  { %v1850_v39 = vpop.f32.mrb[4].mxu1 }
 0x1f7   :  { %v460_v40 = vadd.f32 1.0, %v1850_v39  ;;  %v466_v41 = vadd.f32 1e-30, %v1850_v39  ;;  %v450_v42 = vpop.f32.mrb[5].mxu1 }
 0x1f8   :  { %v459_v43 = vadd.f32 1.0, %v450_v42  ;;  %v465_v44 = vadd.f32 1e-30, %v450_v42 }
 0x1f9   :  { %2295 = vrcp.f32 %v460_v40 }
 0x1fa   :  { %2297 = vrsqrt.f32 %v466_v41 }
 0x1fb   :  { %2299 = vrcp.f32 %v459_v43 }
 0x1fc   :  { %2301 = vrsqrt.f32 %v465_v44 }
 0x203   :  { %v2296_v51 = vpop.eup %2295 }
 0x204   :  { %v2298_v55 = vpop.eup %2297  ;;  %v464_v56 = vmul.f32 %v2296_v51, %v1850_v39 }
 0x205   :  { %v2300_v61 = vpop.eup %2299 }
 0x206   :  { %v470_v63 = vmul.f32 %v2298_v55, %v464_v56  ;;  %v462_v0 = vmul.f32 %v2300_v61, %v450_v42  ;;  %v2302_v1 = vpop.eup %2301 }
 0x208   :  { %v2876_v4 = vmul.f32 %v470_v63, %v2757_v59  ;;  %v469_v5 = vmul.f32 %v2302_v1, %v462_v0 }
 0x20a   :  { %v2885_v10 = vmul.f32 %v469_v5, %v2753_v54  ;;  %v537_v11 = vrot.slane %v2876_v4, 6  ;;  %v533_v12 = vrot.slane %v2876_v4, 5  ;;  %v525_v59 = vrot.slane %v2876_v4, 3 }
 0x20b   :  { %v541_v17 = vrot.slane %v2876_v4, 7  ;;  %v529_v18 = vrot.slane %v2876_v4, 4  ;;  %v517_v22 = vrot.slane %v2876_v4, 1  ;;  %v521_v30 = vrot.slane %v2876_v4, 2 }
 0x20c   :  { %538 = vrot.lane.b32.xlu0 %v537_v11, %s2351_s13  ;;  %534 = vrot.lane.b32.xlu1 %v533_v12, %s2352_s14  ;;  %v482_v54 = vrot.slane %v2885_v10, 3  ;;  %v486_v20 = vrot.slane %v2885_v10, 4  ;;  %v474_v21 = vrot.slane %v2885_v10, 1  ;;  %v478_v33 = vrot.slane %v2885_v10, 2 }
 0x20d   :  { %v490_v35 = vrot.slane %v2885_v10, 5  ;;  %v498_v37 = vrot.slane %v2885_v10, 7  ;;  %v494_v38 = vrot.slane %v2885_v10, 6 }
 0x20e   :  { %v2279_v19 = vpack.i.bf16 %v482_v54, %v525_v59  ;;  %v2284_v31 = vpack.i.bf16 %v486_v20, %v529_v18  ;;  %v2269_v32 = vpack.i.bf16 %v474_v21, %v517_v22  ;;  %v2274_v36 = vpack.i.bf16 %v478_v33, %v521_v30  ;;  %v684_v59 = vld [vmem:[%s3148_s5] sm:$0xff]  ;;  %v690_v21 = vld [vmem:[%s3148_s5 + $0x30] sm:$0xff]  ;;  %v691_v22 = vld [vmem:[%s3148_s5 + $0x38] sm:$0xff] }
 0x20f   :  { %v2358_v54 = vmov 0.0|0.0   ;;  %v2955_v15 = vpack.c.bf16 %v685_v13, %v684_v59  ;;  %v688_v18 = vld [vmem:[%s3148_s5 + $0x20] sm:$0xff]  ;;  %v2989_v23 = vpack.c.bf16 %v691_v22, %v690_v21 }
 0x210   :  { %542 = vrot.lane.b32.xlu0 %v541_v17, %s2353_s1  ;;  %2280 = vrot.lane.b32.xlu1 %v2279_v19, %s2354_s23  ;;  %v2962_v17 = vpack.c.bf16 %v687_v16, %v686_v14  ;;  %v689_v19 = vld [vmem:[%s3148_s5 + $0x28] sm:$0xff]  ;;  %s2361_s5 = smov 64  }
 0x211   :  { %2155 = vmatprep.subr.bf16.mxu0 %v2358_v54  ;;  %2179 = vmatprep.subr.bf16.mxu1 %v2358_v54  ;;  %v2977_v20 = vpack.c.bf16 %v689_v19, %v688_v18 }
 0x212   :  { %2157 = vmatpush3.bf16.msra.mxu0 %v2955_v15 }
 0x213   :  { %2158 = vmatprep.subr.bf16.mxu0 %v2358_v54 }
 0x214   :  { %2285 = vrot.lane.b32.xlu1 %v2284_v31, %s2355_s28  ;;  %2270 = vrot.lane.b32.xlu0 %v2269_v32, %s2356_s29  ;;  %s2364_s29 = smov 88  }
 0x216   :  { %2160 = vmatpush3.bf16.msra.mxu0 %v2962_v17 }
 0x217   :  { %2161 = vmatprep.subr.bf16.mxu0 %v2358_v54 }
 0x218   :  { %491 = vrot.lane.b32.xlu1 %v490_v35, %s2352_s14  ;;  %2275 = vrot.lane.b32.xlu0 %v2274_v36, %s2357_s4 }
 0x21a   :  { %2163 = vmatpush3.bf16.msra.mxu0 %v2977_v20 }
 0x21b   :  { %2164 = vmatprep.subr.bf16.mxu0 %v2358_v54 }
 0x21c   :  { %499 = vrot.lane.b32.xlu1 %v498_v37, %s2353_s1  ;;  %495 = vrot.lane.b32.xlu0 %v494_v38, %s2351_s13 }
 0x21e   :  { %2166 = vmatpush3.bf16.msra.mxu0 %v2989_v23 }
 0x21f   :  { %2167 = vmatprep.subr.bf16.mxu0 %v2358_v54 }
 0x27e   :  { %v539_v39 = vpop.permute.xlu0 %538  ;;  %v535_v40 = vpop.permute.xlu1 %534 }
 0x27f   :  { %v550_v47 = vsel %vm512_vm1, %v535_v40, %v539_v39 }
 0x282   :  { %v543_v41 = vpop.permute.xlu0 %542  ;;  %v2281_v42 = vpop.permute.xlu1 %2280 }
 0x283   :  { %v551_v50 = vsel %vm514_vm2, %v550_v47, %v543_v41  ;;  %v2283_v53 = vunpack.i.h.bf16 %v2281_v42  ;;  %v2282_v55 = vunpack.i.l.bf16 %v2281_v42 }
 0x284   :  { %v555_v3 = vrot.slane %v551_v50, 7 }
 0x286   :  { %v2286_v43 = vpop.permute.xlu1 %2285  ;;  %v2271_v44 = vpop.permute.xlu0 %2270 }
 0x287   :  { %v2273_v45 = vunpack.i.h.bf16 %v2271_v44  ;;  %v2272_v46 = vunpack.i.l.bf16 %v2271_v44  ;;  %v2288_v58 = vunpack.i.h.bf16 %v2286_v43  ;;  %v2287_v60 = vunpack.i.l.bf16 %v2286_v43 }
 0x289   :  { %v503_v56 = vsel %vm502_vm3, %v2885_v10, %v2273_v45  ;;  %v545_v57 = vsel %vm502_vm3, %v2876_v4, %v2272_v46 }
 0x28a   :  { %v492_v48 = vpop.permute.xlu1 %491  ;;  %v2276_v49 = vpop.permute.xlu0 %2275 }
 0x28b   :  { %v2278_v51 = vunpack.i.h.bf16 %v2276_v49  ;;  %v2277_v52 = vunpack.i.l.bf16 %v2276_v49 }
 0x28d   :  { %v505_v61 = vsel %vm504_vm4, %v503_v56, %v2278_v51  ;;  %v546_v62 = vsel %vm504_vm4, %v545_v57, %v2277_v52 }
 0x28e   :  { %v507_v63 = vsel %vm506_vm5, %v505_v61, %v2283_v53  ;;  %v547_v0 = vsel %vm506_vm5, %v546_v62, %v2282_v55  ;;  %v500_v1 = vpop.permute.xlu1 %499  ;;  %v496_v2 = vpop.permute.xlu0 %495 }
 0x28f   :  { %v513_v5 = vsel %vm512_vm1, %v492_v48, %v496_v2  ;;  %v509_v6 = vsel %vm508_vm6, %v507_v63, %v2288_v58  ;;  %v548_v7 = vsel %vm508_vm6, %v547_v0, %v2287_v60 }
 0x290   :  { %v515_v4 = vsel %vm514_vm2, %v513_v5, %v500_v1  ;;  %v549_v8 = vsel %vm510_vm7, %v548_v7, %v535_v40  ;;  %v511_v11 = vsel %vm510_vm7, %v509_v6, %v492_v48 }
 0x291   :  { %v560_v9 = vsel %vm558_vm8, %v515_v4, %v555_v3  ;;  %v554_v10 = vrot.slane %v549_v8, 7 }
 0x292   :  { %1627 = vmatprep.mubr.msk.f32.mxu1 %vm609_vm9, %v560_v9 }
 0x293   :  { %v559_v12 = vsel %vm558_vm8, %v511_v11, %v554_v10 }
 0x294   :  { %678 = vmatmul.mubr.f32.vlgmr.msra.gmra.mrb[6].mxu1 %v559_v12 }
 0x295   :  { %2181 = vmatpush3.bf16.msra.mxu1 %v2955_v15  ;;  %1905 = vmatprep.mubr.msk.f32.mxu1 %vm2359_vm10, %v2360_v24 }
 0x296   :  { %2182 = vmatprep.subr.bf16.mxu1 %v2358_v54 }
 0x299   :  { %2184 = vmatpush3.bf16.msra.mxu1 %v2962_v17 }
 0x29a   :  { %2185 = vmatprep.subr.bf16.mxu1 %v2358_v54 }
 0x29d   :  { %2187 = vmatpush3.bf16.msra.mxu1 %v2977_v20 }
 0x29e   :  { %2188 = vmatprep.subr.bf16.mxu1 %v2358_v54 }
 0x2a1   :  { %2190 = vmatpush3.bf16.msra.mxu1 %v2989_v23 }
 0x2a2   :  { %2203 = vmatprep.subr.bf16.mxu1 %v2358_v54 }
 0x367   :  { %v2999_v25 = vpop.f32.mrb[6].mxu1 }
 0x368   :  { %693 = vrot.lane.b32.xlu0 %v2999_v25, %s2361_s5  ;;  %v3003_v26 = vpop.f32.mrb[7].mxu1 }
 0x3da   :  { %v3005_v27 = vpop.permute.xlu0 %693 }
 0x3db   :  { %v696_v28 = vadd.f32 %v3005_v27, %v2999_v25 }
 0x3dd   :  { %v697_v29 = vadd.f32 %v696_v28, %v3003_v26 }
 0x3df   :  { %v698_v30 = vmul.f32 0.33333334, %v697_v29 }
 0x3e1   :  { %v699_v31 = vmul.f32 %v698_v30, %v698_v30 }
 0x3e3   :  { %1868 = vmatmul.mubr.msk.f32.vlgmr.msra.gmra.mrb[8].mxu0 %vm609_vm9, %v699_v31 }
 0x3e4   :  { %2169 = vmatpush3.bf16.msra.mxu0 %v2955_v15  ;;  %1886 = vmatprep.mubr.msk.f32.mxu0 %vm2359_vm10, %v2360_v24 }
 0x3e5   :  { %2170 = vmatprep.subr.bf16.mxu0 %v2358_v54 }
 0x3e8   :  { %2172 = vmatpush3.bf16.msra.mxu0 %v2962_v17 }
 0x3e9   :  { %2173 = vmatprep.subr.bf16.mxu0 %v2358_v54 }
 0x3ec   :  { %2175 = vmatpush3.bf16.msra.mxu0 %v2977_v20 }
 0x3ed   :  { %2176 = vmatprep.subr.bf16.mxu0 %v2358_v54 }
 0x3f0   :  { %2178 = vmatpush3.bf16.msra.mxu0 %v2989_v23 }
 0x3f1   :  { %2191 = vmatprep.subr.bf16.mxu0 %v2358_v54 }
 0x4b6   :  { %v769_v32 = vpop.f32.mrb[8].mxu0 }
 0x4b7   :  { %v773_v33 = vadd.f32 1.0, %v769_v32  ;;  %v776_v34 = vadd.f32 1e-30, %v769_v32  ;;  %v1869_v35 = vpop.f32.mrb[9].mxu0 }
 0x4b9   :  { %2303 = vrcp.f32 %v773_v33 }
 0x4ba   :  { %2305 = vrsqrt.f32 %v776_v34 }
 0x4c3   :  { %v2304_v36 = vpop.eup %2303 }
 0x4c4   :  { %v775_v37 = vmul.f32 %v2304_v36, %v769_v32  ;;  %v2306_v38 = vpop.eup %2305 }
 0x4c6   :  { %v778_v39 = vmul.f32 %v2306_v38, %v775_v37 }
 0x4c8   :  { %v779_v40 = vmul.f32 %v778_v39, %v698_v30 }
 0x4ca   :  { %855 = vrot.lane.b32.xlu1 %v779_v40, %s2361_s5  ;;  %v780_v41 = vmul.f32 %v779_v40, %v2999_v25  ;;  %v934_v42 = vmul.f32 %v779_v40, %v3003_v26 }
 0x4cc   :  { %1887 = vmatmul.mubr.msk.f32.vlgmr.msra.gmra.mrb[10].mxu0 %vm609_vm9, %v780_v41 }
 0x4cd   :  { %2193 = vmatpush3.bf16.msra.mxu0 %v2955_v15  ;;  %1924 = vmatprep.mubr.msk.f32.mxu0 %vm2359_vm10, %v2360_v24 }
 0x4ce   :  { %2194 = vmatprep.subr.bf16.mxu0 %v2358_v54 }
 0x4d1   :  { %2196 = vmatpush3.bf16.msra.mxu0 %v2962_v17 }
 0x4d2   :  { %2197 = vmatprep.subr.bf16.mxu0 %v2358_v54 }
 0x4d5   :  { %2199 = vmatpush3.bf16.msra.mxu0 %v2977_v20 }
 0x4d6   :  { %2200 = vmatprep.subr.bf16.mxu0 %v2358_v54 }
 0x4d9   :  { %2202 = vmatpush3.bf16.msra.mxu0 %v2989_v23 }
 0x4da   :  { %2215 = vmatprep.subr.bf16.mxu0 %v2358_v54 }
 0x4dc   :  { %1925 = vmatmul.mubr.msk.f32.vlgmr.msra.gmra.mrb[12].mxu0 %vm609_vm9, %v934_v42 }
 0x4dd   :  { %2217 = vmatpush3.bf16.msra.mxu0 %v2955_v15  ;;  %1962 = vmatprep.mubr.msk.f32.mxu0 %vm2359_vm10, %v2360_v24 }
 0x4de   :  { %2218 = vmatprep.subr.bf16.mxu0 %v2358_v54 }
 0x4e1   :  { %2220 = vmatpush3.bf16.msra.mxu0 %v2962_v17 }
 0x4e2   :  { %2221 = vmatprep.subr.bf16.mxu0 %v2358_v54 }
 0x4e5   :  { %2223 = vmatpush3.bf16.msra.mxu0 %v2977_v20 }
 0x4e6   :  { %2224 = vmatprep.subr.bf16.mxu0 %v2358_v54 }
 0x4e9   :  { %2226 = vmatpush3.bf16.msra.mxu0 %v2989_v23 }
 0x4ea   :  { %2239 = vmatprep.subr.bf16.mxu0 %v2358_v54 }
 0x53c   :  { %v856_v43 = vpop.permute.xlu1 %855 }
 0x53d   :  { %v858_v44 = vmul.f32 %v856_v43, %v2999_v25 }
 0x53f   :  { %860 = vrot.lane.b32.xlu0 %v858_v44, %s2361_s5 }
 0x59f   :  { %v3048_v45 = vpop.f32.mrb[10].mxu0 }
 0x5a0   :  { %v1888_v46 = vpop.f32.mrb[11].mxu0 }
 0x5af   :  { %v3050_v47 = vpop.f32.mrb[12].mxu0 }
 0x5b0   :  { %v1926_v48 = vpop.f32.mrb[13].mxu0 }
 0x5b1   :  { %v861_v49 = vpop.permute.xlu0 %860 }
 0x5b2   :  { %1906 = vmatmul.mubr.msk.f32.vlgmr.msra.gmra.mrb[8].mxu1 %vm609_vm9, %v861_v49 }
 0x5b3   :  { %2205 = vmatpush3.bf16.msra.mxu1 %v2955_v15  ;;  %1943 = vmatprep.mubr.msk.f32.mxu1 %vm2359_vm10, %v2360_v24 }
 0x5b4   :  { %2206 = vmatprep.subr.bf16.mxu1 %v2358_v54 }
 0x5b7   :  { %2208 = vmatpush3.bf16.msra.mxu1 %v2962_v17 }
 0x5b8   :  { %2209 = vmatprep.subr.bf16.mxu1 %v2358_v54 }
 0x5bb   :  { %2211 = vmatpush3.bf16.msra.mxu1 %v2977_v20 }
 0x5bc   :  { %2212 = vmatprep.subr.bf16.mxu1 %v2358_v54 }
 0x5bf   :  { %2214 = vmatpush3.bf16.msra.mxu1 %v2989_v23 }
 0x5c0   :  { %2227 = vmatprep.subr.bf16.mxu1 %v2358_v54 }
 0x685   :  { %v3063_v50 = vpop.f32.mrb[8].mxu1 }
 0x686   :  { %v1008_v51 = vmax.f32 %v3048_v45, %v3063_v50  ;;  %v1907_v52 = vpop.f32.mrb[9].mxu1 }
 0x688   :  { %v1009_v53 = vmax.f32 %v1008_v51, %v3050_v47 }
 0x68a   :  { %v1010_v55 = vsub.f32 %v3048_v45, %v1009_v53  ;;  %v1013_v56 = vsub.f32 %v3063_v50, %v1009_v53  ;;  %v1016_v57 = vsub.f32 %v3050_v47, %v1009_v53 }
 0x68c   :  { %v1011_v58 = vmul.f32 1.442695, %v1010_v55  ;;  %v1014_v60 = vmul.f32 1.442695, %v1013_v56  ;;  %v1017_v61 = vmul.f32 1.442695, %v1016_v57 }
 0x68d   :  { %v1395_v55 = vld [vmem:[%s3149_s6] sm:$0xff]  ;;  %v1396_v56 = vld [vmem:[%s3149_s6 + $0x8] sm:$0xff] }
 0x68e   :  { %2307 = vpow2.f32 %v1011_v58  ;;  %v1637_v57 = vcombine.high %v1395_v55, %v1395_v55  ;;  %v1636_v58 = vcombine.low %v1395_v55, %v1395_v55 }
 0x68f   :  { %2309 = vpow2.f32 %v1014_v60  ;;  %v1639_v60 = vcombine.high %v1396_v56, %v1396_v56 }
 0x690   :  { %2311 = vpow2.f32 %v1017_v61  ;;  %v1450_v61 = vsel %vm1387_vm11, %v1636_v58, 0 }
 0x698   :  { %v2308_v62 = vpop.eup %2307 }
 0x699   :  { %v2310_v63 = vpop.eup %2309  ;;  %v1022_v0 = vmul.f32 %v2308_v62, %v2999_v25 }
 0x69a   :  { %v2312_v1 = vpop.eup %2311  ;;  %v1019_v2 = vadd.f32 %v2310_v63, %v2308_v62  ;;  %v1023_v3 = vmul.f32 %v2310_v63, %v3005_v27 }
 0x69b   :  { %v1025_v5 = vmul.f32 %v2312_v1, %v3003_v26 }
 0x69c   :  { %v1020_v6 = vadd.f32 %v2312_v1, %v1019_v2  ;;  %v1024_v7 = vadd.f32 %v1023_v3, %v1022_v0  ;;  %v1397_v0 = vld [vmem:[%s3149_s6 + $0x10] sm:$0xff]  ;;  %v2362_v1 = vmov 0  }
 0x69d   :  { %v1641_v2 = vcombine.high %v1397_v0, %v1397_v0 }
 0x69e   :  { %2313 = vrcp.f32 %v1020_v6  ;;  %v1026_v4 = vadd.f32 %v1025_v5, %v1024_v7 }
 0x6a8   :  { %v2314_v8 = vpop.eup %2313 }
 0x6a9   :  { %v1027_v9 = vmul.f32 %v2314_v8, %v1026_v4 }
 0x6ab   :  { %v1028_v10 = vmul.f32 %v1027_v9, %v1027_v9 }
 0x6ad   :  { %1944 = vmatmul.mubr.msk.f32.vlgmr.msra.gmra.mrb[10].mxu1 %vm609_vm9, %v1028_v10 }
 0x6ae   :  { %2229 = vmatpush3.bf16.msra.mxu1 %v2955_v15  ;;  %1981 = vmatprep.mubr.msk.f32.mxu1 %vm2359_vm10, %v2360_v24 }
 0x6af   :  { %2230 = vmatprep.subr.bf16.mxu1 %v2358_v54 }
 0x6b2   :  { %2232 = vmatpush3.bf16.msra.mxu1 %v2962_v17 }
 0x6b3   :  { %2233 = vmatprep.subr.bf16.mxu1 %v2358_v54 }
 0x6b6   :  { %2235 = vmatpush3.bf16.msra.mxu1 %v2977_v20 }
 0x6b7   :  { %2236 = vmatprep.subr.bf16.mxu1 %v2358_v54 }
 0x6ba   :  { %2238 = vmatpush3.bf16.msra.mxu1 %v2989_v23 }
 0x6bb   :  { %1642 = vmatprep.subr.msk.bf16.mxu1 %vm1387_vm11, %v1637_v57 }
 0x780   :  { %v1098_v11 = vpop.f32.mrb[10].mxu1 }
 0x781   :  { %v1102_v12 = vadd.f32 1.0, %v1098_v11  ;;  %v1105_v59 = vadd.f32 1e-30, %v1098_v11  ;;  %v1945_v13 = vpop.f32.mrb[11].mxu1 }
 0x783   :  { %2315 = vrcp.f32 %v1102_v12 }
 0x784   :  { %2317 = vrsqrt.f32 %v1105_v59 }
 0x78d   :  { %v2316_v14 = vpop.eup %2315 }
 0x78e   :  { %v1104_v16 = vmul.f32 %v2316_v14, %v1098_v11  ;;  %v2318_v18 = vpop.eup %2317  ;;  %v1640_v11 = vcombine.low %v1397_v0, %v1397_v0 }
 0x790   :  { %v1107_v19 = vmul.f32 %v2318_v18, %v1104_v16 }
 0x792   :  { %v1108_v21 = vmul.f32 %v1107_v19, %v1027_v9 }
 0x794   :  { %1185 = vrot.lane.b32.xlu1 %v1108_v21, %s2361_s5  ;;  %v1109_v22 = vmul.f32 %v1108_v21, %v2999_v25  ;;  %v1265_v28 = vmul.f32 %v1108_v21, %v3003_v26  ;;  %v1462_v21 = vsel %vm1387_vm11, %v1640_v11, 0 }
 0x796   :  { %1963 = vmatmul.mubr.msk.f32.vlgmr.msra.gmra.mrb[14].mxu0 %vm609_vm9, %v1109_v22  ;;  %v1400_v22 = vlaneseq }
 0x797   :  { %2241 = vmatpush3.bf16.msra.mxu0 %v2955_v15  ;;  %2000 = vmatprep.mubr.msk.f32.mxu0 %vm2359_vm10, %v2360_v24 }
 0x798   :  { %2242 = vmatprep.subr.bf16.mxu0 %v2358_v54 }
 0x79b   :  { %2244 = vmatpush3.bf16.msra.mxu0 %v2962_v17 }
 0x79c   :  { %2245 = vmatprep.subr.bf16.mxu0 %v2358_v54 }
 0x79f   :  { %2247 = vmatpush3.bf16.msra.mxu0 %v2977_v20 }
 0x7a0   :  { %2248 = vmatprep.subr.bf16.mxu0 %v2358_v54 }
 0x7a3   :  { %2250 = vmatpush3.bf16.msra.mxu0 %v2989_v23 }
 0x7a4   :  { %1644 = vmatprep.subr.msk.bf16.mxu0 %vm1387_vm11, %v1639_v60 }
 0x7a6   :  { %2001 = vmatmul.mubr.msk.f32.vlgmr.msra.gmra.mrb[16].mxu0 %vm609_vm9, %v1265_v28  ;;  %v1401_v28 = vshrl.u32 %v1400_v22, 7 }
 0x7a7   :  { %1542 = vmatprep.mubr.bf16.mxu0 %v2362_v1 }
 0x806   :  { %v1186_v29 = vpop.permute.xlu1 %1185 }
 0x807   :  { %v1188_v15 = vmul.f32 %v1186_v29, %v2999_v25  ;;  %v1402_v29 = vsub.s32 0, %v1401_v28 }
 0x809   :  { %1190 = vrot.lane.b32.xlu0 %v1188_v15, %s2361_s5  ;;  %v1410_v15 = vsub.s32 2, %v1401_v28 }
 0x869   :  { %v1179_v24 = vpop.f32.mrb[14].mxu0 }
 0x86a   :  { %v1183_v30 = vadd.f32 %v1179_v24, %v3048_v45  ;;  %v1964_v31 = vpop.f32.mrb[15].mxu0  ;;  %v1398_v24 = vld [vmem:[%s3150_s7] sm:$0x3f]  ;;  %s2367_s7 = smov [#allocation2]  }
 0x86b   :  { %v1414_v31 = vsub.s32 3, %v1401_v28  ;;  %s1613_s30 = sshll.u32 %s2367_s7, 4  ;;  %s1614_s30 = int_to_ptr.vmem [resolvable:$true] %s1613_s30 }
 0x86c   :  { %s2327_s2 = scalar_lea.vmem %s1614_s30, 1536  ;;  %p2332_p1 = scmp.lt.s32.totalorder %s1614_s30, %s1614_s30 }
 0x86d   :  { %p2328_p0 = scmp.ne.s32.totalorder %s1614_s30, %s2327_s2  ;;  %p2333_p2 = scmp.lt.s32.totalorder %s2327_s2, %s2327_s2 }
 0x86f   :  { %p2334_p3 = por %p2333_p2, %p2332_p1 }
 0x871   :  { %p2335_p4 = pnand %p2334_p3, %p2328_p0 }
 0x879   :  { %v1335_v17 = vpop.f32.mrb[16].mxu0 }
 0x87a   :  { %v1339_v32 = vadd.f32 %v1335_v17, %v3050_v47  ;;  %v2002_v33 = vpop.f32.mrb[17].mxu0  ;;  %v1403_v17 = vrot.slane %v1398_v24, %v1402_v29 }
 0x87b   :  { %v1191_v20 = vpop.permute.xlu0 %1190 }
 0x87c   :  { %1982 = vmatmul.mubr.msk.f32.vlgmr.msra.gmra.mrb[12].mxu1 %vm609_vm9, %v1191_v20  ;;  %v1415_v20 = vrot.slane %v1398_v24, %v1414_v31 }
 0x87d   :  { %1468 = vmatpush1.bf16.msra.mxu1 %v1450_v61  ;;  %1499 = vmatprep.mubr.bf16.mxu1 %v2362_v1 }
 0x87e   :  { %1646 = vmatprep.subr.msk.bf16.mxu1 %vm1387_vm11, %v1641_v2 }
 0x94f   :  { %v1260_v54 = vpop.f32.mrb[12].mxu1 }
 0x950   :  { %v1264_v23 = vadd.f32 %v1260_v54, %v3063_v50  ;;  %v1983_v34 = vpop.f32.mrb[13].mxu1 }
 0x952   :  { %v1340_v35 = vmax.f32 %v1183_v30, %v1264_v23 }
 0x954   :  { %v1341_v36 = vmax.f32 %v1340_v35, %v1339_v32 }
 0x956   :  { %v1342_v37 = vsub.f32 %v1183_v30, %v1341_v36  ;;  %v1345_v38 = vsub.f32 %v1264_v23, %v1341_v36  ;;  %v1348_v39 = vsub.f32 %v1339_v32, %v1341_v36  ;;  %v1406_v30 = vsub.s32 1, %v1401_v28 }
 0x957   :  { %v1411_v32 = vrot.slane %v1398_v24, %v1410_v15 }
 0x958   :  { %v1343_v40 = vmul.f32 1.442695, %v1342_v37  ;;  %v1346_v41 = vmul.f32 1.442695, %v1345_v38  ;;  %v1349_v42 = vmul.f32 1.442695, %v1348_v39  ;;  %v1407_v33 = vrot.slane %v1398_v24, %v1406_v30 }
 0x959   :  { %v1418_v38 = vsub.s32 4, %v1401_v28 }
 0x95a   :  { %2319 = vpow2.f32 %v1343_v40 }
 0x95b   :  { %2321 = vpow2.f32 %v1346_v41 }
 0x95c   :  { %2323 = vpow2.f32 %v1349_v42 }
 0x964   :  { %v2320_v43 = vpop.eup %2319 }
 0x965   :  { %v2322_v44 = vpop.eup %2321  ;;  %v1354_v45 = vmul.f32 %v2320_v43, %v2999_v25 }
 0x966   :  { %v2324_v46 = vpop.eup %2323  ;;  %v1351_v47 = vadd.f32 %v2322_v44, %v2320_v43  ;;  %v1355_v48 = vmul.f32 %v2322_v44, %v3005_v27  ;;  %v1638_v27 = vcombine.low %v1396_v56, %v1396_v56  ;;  %v1422_v43 = vsub.s32 5, %v1401_v28 }
 0x967   :  { %v1357_v49 = vmul.f32 %v2324_v46, %v3003_v26 }
 0x968   :  { %v1352_v50 = vadd.f32 %v2324_v46, %v1351_v47  ;;  %v1356_v51 = vadd.f32 %v1355_v48, %v1354_v45  ;;  %v1456_v62 = vsel %vm1387_vm11, %v1638_v27, 0 }
 0x969   :  { %1511 = vmatpush1.bf16.msra.mxu0 %v1456_v62 }
 0x96a   :  { %2325 = vrcp.f32 %v1352_v50  ;;  %v1358_v52 = vadd.f32 %v1357_v49, %v1356_v51  ;;  %v1419_v50 = vrot.slane %v1398_v24, %v1418_v38  ;;  %v1423_v51 = vrot.slane %v1398_v24, %v1422_v43 }
 0x974   :  { %v2326_v53 = vpop.eup %2325 }
 0x975   :  { %v1359_v25 = vmul.f32 %v2326_v53, %v1358_v52 }
 0x977   :  { %1373 = vrot.lane.b32.xlu0 %v1359_v25, %s2355_s28  ;;  %v1361_v26 = vrot.slane %v1359_v25, 6  ;;  %v1365_v63 = vrot.slane %v1359_v25, 4  ;;  %s2363_s28 = smov 112   ;;  %v1369_v3 = vrot.slane %v1359_v25, 2 }
 0x979   :  { %1362 = vrot.lane.b32.xlu1 %v1361_v26, %s2352_s14  ;;  %s2366_s14 = smov 80  }
 0x97b   :  { %1366 = vrot.lane.b32.xlu0 %v1365_v63, %s2363_s28 }
 0x97d   :  { %1376 = vrot.lane.b32.xlu1 %v1361_v26, %s2364_s29 }
 0x97f   :  { %1370 = vrot.lane.b32.xlu0 %v1369_v3, %s2365_s0 }
 0x981   :  { %1379 = vrot.lane.b32.xlu1 %v1365_v63, %s2366_s14 }
 0x985   :  { %1382 = vrot.lane.b32.xlu1 %v1369_v3, %s2354_s23 }
 0x9e9   :  { %v1374_v5 = vpop.permute.xlu0 %1373 }
 0x9eb   :  { %v1363_v6 = vpop.permute.xlu1 %1362 }
 0x9ec   :  { %v1386_v9 = vsel %vm1385_vm12, %v1359_v25, %v1363_v6 }
 0x9ed   :  { %v1367_v7 = vpop.permute.xlu0 %1366 }
 0x9ee   :  { %v1388_v59 = vsel %vm1387_vm11, %v1386_v9, %v1367_v7 }
 0x9ef   :  { %v1377_v4 = vpop.permute.xlu1 %1376 }
 0x9f0   :  { %v1391_v12 = vsel %vm1385_vm12, %v1374_v5, %v1377_v4 }
 0x9f1   :  { %v1371_v10 = vpop.permute.xlu0 %1370 }
 0x9f2   :  { %v1390_v16 = vsel %vm1389_vm13, %v1388_v59, %v1371_v10 }
 0x9f3   :  { %v1380_v8 = vpop.permute.xlu1 %1379 }
 0x9f4   :  { %v1392_v13 = vsel %vm1387_vm11, %v1391_v12, %v1380_v8 }
 0x9f7   :  { %v1383_v14 = vpop.permute.xlu1 %1382 }
 0x9f8   :  { %v1393_v18 = vsel %vm1389_vm13, %v1392_v13, %v1383_v14 }
 0x9f9   :  { %v1394_v19 = vpack.c.bf16 %v1393_v18, %v1390_v16 }
 0x9fb   :  { %1643 = vmatmul.mubr.msk.bf16.vlgmr.msra.gmra.mrb[16].mxu1 %vm1445_vm14, %v1394_v19  ;;  %1645 = vmatmul.mubr.msk.bf16.vlgmr.msra.gmra.mrb[20].mxu0 %vm1445_vm14, %v1394_v19 }
 0x9fc   :  { %1554 = vmatpush1.bf16.msra.mxu1 %v1462_v21  ;;  %1585 = vmatprep.mubr.bf16.mxu1 %v2362_v1 }
 0xa03   :  { %1647 = vmatmul.mubr.msk.bf16.vlgmr.msra.gmra.mrb[20].mxu1 %vm1445_vm14, %v1394_v19 }
 0xace   :  { %v1501_v54 = vpop.f32.mrb[16].mxu1  ;;  %v1544_v23 = vpop.f32.mrb[20].mxu0 }
 0xacf   :  { %v1502_v34 = vadd.f32 %v1501_v54, %v1403_v17  ;;  %v1545_v35 = vadd.f32 %v1544_v23, %v1411_v32  ;;  %v1503_v36 = vpop.f32.mrb[17].mxu1  ;;  %v1546_v37 = vpop.f32.mrb[21].mxu0 }
 0xad0   :  { %v1504_v39 = vadd.f32 %v1503_v36, %v1407_v33  ;;  %v1547_v40 = vadd.f32 %v1546_v37, %v1415_v20  ;;  %v1505_v41 = vpop.f32.mrb[18].mxu1  ;;  %v1548_v42 = vpop.f32.mrb[22].mxu0 }
 0xad1   :  { %1596 = vst [vmem:[#allocation2] sm:$0xff] %v1502_v34  ;;  %1598 = vst [vmem:[#allocation2 + $0x10] sm:$0xff] %v1545_v35  ;;  %v1506_v44 = vadd.f32 %v1505_v41, %v1403_v17  ;;  %v1549_v45 = vadd.f32 %v1548_v42, %v1411_v32  ;;  %v1507_v46 = vpop.f32.mrb[19].mxu1  ;;  %v1550_v47 = vpop.f32.mrb[23].mxu0 }
 0xad2   :  { %1597 = vst [vmem:[#allocation2 + $0x8] sm:$0xff] %v1504_v39  ;;  %1599 = vst [vmem:[#allocation2 + $0x18] sm:$0xff] %v1547_v40  ;;  %v1508_v48 = vadd.f32 %v1507_v46, %v1407_v33  ;;  %v1551_v49 = vadd.f32 %v1550_v47, %v1415_v20 }
 0xad3   :  { %1602 = vst [vmem:[#allocation2 + $0x30] sm:$0xff] %v1506_v44  ;;  %1604 = vst [vmem:[#allocation2 + $0x40] sm:$0xff] %v1549_v45 }
 0xad4   :  { %1603 = vst [vmem:[#allocation2 + $0x38] sm:$0xff] %v1508_v48  ;;  %1605 = vst [vmem:[#allocation2 + $0x48] sm:$0xff] %v1551_v49 }
 0xad6   :  { %v1587_v52 = vpop.f32.mrb[20].mxu1 }
 0xad7   :  { %v1588_v53 = vadd.f32 %v1587_v52, %v1419_v50  ;;  %v1589_v55 = vpop.f32.mrb[21].mxu1 }
 0xad8   :  { %v1590_v56 = vadd.f32 %v1589_v55, %v1423_v51  ;;  %v1591_v25 = vpop.f32.mrb[22].mxu1 }
 0xad9   :  { %1600 = vst [vmem:[#allocation2 + $0x20] sm:$0xff] %v1588_v53  ;;  %v1592_v57 = vadd.f32 %v1591_v25, %v1419_v50  ;;  %v1593_v58 = vpop.f32.mrb[23].mxu1 }
 0xada   :  { %1601 = vst [vmem:[#allocation2 + $0x28] sm:$0xff] %v1590_v56  ;;  %v1594_v60 = vadd.f32 %v1593_v58, %v1423_v51 }
 0xadb   :  { %1606 = vst [vmem:[#allocation2 + $0x50] sm:$0xff] %v1592_v57 }
 0xadc   :  { %1607 = vst [vmem:[#allocation2 + $0x58] sm:$0xff] %v1594_v60 }
 0xadd   :  { %2338 = shalt.err (!%p2335_p4)
}
 0xade   :  { %s2339_s10 = scalar_lea.hbm %s3151_s8, 1536 }
 0xadf   :  { %p2340_p5 = scmp.ne.s32.totalorder %s3151_s8, %s2339_s10  ;;  %p2343_p6 = scmp.lt.u32.totalorder %s2339_s10, %s3151_s8 }
 0xae1   :  { %p2345_p7 = pnand %p2343_p6, %p2340_p5 }
 0xae3   :  { %2348 = shalt.err (!%p2345_p7)
}
 0xae4   :  { %s2368_s16 = smov 768  }
 0xae5   :  { %1619 = dma.vmem_to_hbm [thread:$0]  %s1614_s30, 1536, %s3151_s8, [#allocation3], %s2368_s16, %s2368_s16, %s2357_s4  }
 0xae6   :  { %2349 = dma.done.wait [#allocation3], 1536  }
 0xae7   :  { %2350 = vsyncadd [#allocation3], 4294965760 }
 0xae8   :  { %1623 = vsyncpa [#allocation3], 1 }

</bundles_post_ra>
